<compile_context>
chip_gen: v6e
topology: v6e:2x2x1
jax: 0.10.0
libtpu: 0.0.40
codegen_flags: <defaults>
</compile_context>

<pallas_src>
import functools

import jax
import jax.numpy as jnp
from jax.experimental import pallas as pl
from jax.experimental.pallas import tpu as pltpu


def _round_up(x, m):
    return ((x + m - 1) // m) * m


# ---------------------------------------------------------------------------
# Fused kernel: MLP -> LSTM -> heads (+ packed state), one invocation.
# ---------------------------------------------------------------------------
def _make_agent_kernel(T, B, H, n_mlp_layers):
    def kernel(*refs):
        # ----- unpack refs (inputs..., single packed output last) ----------
        x_ref, h0_ref, c0_ref = refs[0:3]                 # (T*B,ob), (B,H), (B,H)
        mlp_refs = refs[3:3 + 2 * n_mlp_layers]
        (wih_ref, whh_ref, bl_ref,                        # (H,4H),(H,4H),(1,4H)
         wh1_ref, bh1_ref, wh2_ref, bh2_ref,              # (H,128),(1,128),(128,P),(1,P)
         ph_ref, pc_ref) = refs[3 + 2 * n_mlp_layers:
                                3 + 2 * n_mlp_layers + 9]  # (H,P),(H,P)
        out_ref = refs[-1]                                # (B, P)

        # ----- MLP over all T*B rows at once -------------------------------
        h = x_ref[...]
        for l in range(n_mlp_layers):
            w = mlp_refs[2 * l][...]
            b = mlp_refs[2 * l + 1][...]
            h = jnp.maximum(
                jnp.dot(h, w, preferred_element_type=jnp.float32) + b, 0.0)
        # h: (T*B, H)

        # ----- LSTM: x-projection for every timestep in ONE matmul ---------
        # bih + bhh pre-summed into bl_ref; gate columns packed [i | f | o | g].
        xg_all = (jnp.dot(h, wih_ref[...], preferred_element_type=jnp.float32)
                  + bl_ref[...])                          # (T*B, 4H)

        whh = whh_ref[...]                                # (H, 4H)
        hh = h0_ref[...]                                  # (B, H)
        cc = c0_ref[...]                                  # (B, H)
        for t in range(T):                                # static unrolled loop
            g = xg_all[t * B:(t + 1) * B, :] + jnp.dot(
                hh, whh, preferred_element_type=jnp.float32)   # (B, 4H)
            s = jax.nn.sigmoid(g)                         # ONE full-vreg EUP pass
            i_g = s[:, 0 * H:1 * H]
            f_g = s[:, 1 * H:2 * H]
            o_g = s[:, 2 * H:3 * H]
            g_g = jnp.tanh(g[:, 3 * H:4 * H])             # tanh gate (last H lanes)
            cc = f_g * cc + i_g * g_g
            hh = o_g * jnp.tanh(cc)

        # ----- heads + state, packed into one lane-dense (B, P) slab -------
        a = jnp.maximum(
            jnp.dot(hh, wh1_ref[...], preferred_element_type=jnp.float32)
            + bh1_ref[...], 0.0)                          # (B, 128), lanes>=2H are 0
        out = (jnp.dot(a, wh2_ref[...], preferred_element_type=jnp.float32)
               + bh2_ref[...])                            # logits | value | zeros
        # place h_n / c_n into their lane offsets via permutation matmuls
        out = out + jnp.dot(hh, ph_ref[...], preferred_element_type=jnp.float32)
        out = out + jnp.dot(cc, pc_ref[...], preferred_element_type=jnp.float32)
        out_ref[...] = out                                # single unmasked store

    return kernel


# ---------------------------------------------------------------------------
# Forward wrapper
# ---------------------------------------------------------------------------
@functools.partial(jax.jit, static_argnames=("ac_dim",))
def agent_net_forward(params, ts_ob_no, state_tuple=None, *, ac_dim):
    T, B, ob_dim = ts_ob_no.shape
    H = params["lstm"]["whh"].shape[0]
    n_mlp = len(params["mlp"])

    # keep t*B slices sublane-aligned (f32 sublane = 8 rows)
    assert B % 8 == 0, "pad batch to a multiple of 8 before calling the kernel"

    if state_tuple is None:
        # reference builds zeros(1, ts_ob_no.size(0), H) -> only consistent
        # when T == B; mirror that and make the requirement explicit.
        assert T == B, "zero initial state uses size(0) as batch (requires T == B)"
        h0 = jnp.zeros((B, H), jnp.float32)
        c0 = jnp.zeros((B, H), jnp.float32)
    else:
        h0 = state_tuple[0][0]
        c0 = state_tuple[1][0]

    x = ts_ob_no.reshape(T * B, ob_dim)

    off_h = ac_dim + 1          # lane offset of h_n in the packed output
    off_c = off_h + H           # lane offset of c_n
    out_pad = params["heads"]["w2"].shape[1]

    args = [x, h0, c0]
    for (w, b) in params["mlp"]:
        args += [w, b]
    args += [params["lstm"]["wih"], params["lstm"]["whh"], params["lstm"]["b"],
             params["heads"]["w1"], params["heads"]["b1"],
             params["heads"]["w2"], params["heads"]["b2"],
             params["heads"]["ph"], params["heads"]["pc"]]

    vmem = pl.BlockSpec(memory_space=pltpu.MemorySpace.VMEM)
    packed = pl.pallas_call(
        _make_agent_kernel(T, B, H, n_mlp),
        out_shape=jax.ShapeDtypeStruct((B, out_pad), jnp.float32),
        in_specs=[vmem] * len(args),
        out_specs=vmem,
    )(*args)

    logits = packed[:, :ac_dim]
    val = packed[:, ac_dim:ac_dim + 1]
    h_n = packed[:, off_h:off_h + H]
    c_n = packed[:, off_c:off_c + H]
    next_state = (h_n[None, :, :], c_n[None, :, :])
    return logits, val, next_state


# ---------------------------------------------------------------------------
# Parameter init (synthetic, deterministic; mirrors the PyTorch module shapes,
# stored pre-packed for the fused kernel).
# ---------------------------------------------------------------------------
def init_params(key, ob_dim, ac_dim, hidden, n_layers):
    keys = iter(jax.random.split(key, 64))

    def xavier_t(fan_in, fan_out):
        bound = (6.0 / (fan_in + fan_out)) ** 0.5
        return jax.random.uniform(next(keys), (fan_in, fan_out),
                                  jnp.float32, -bound, bound)

    def lin_bias(fan_in, fan_out):
        bound = 1.0 / (fan_in ** 0.5)
        return jax.random.uniform(next(keys), (1, fan_out),
                                  jnp.float32, -bound, bound)

    params = {}

    # MLP: ob_dim -> hidden -> ... -> hidden (weights stored transposed)
    mlp = []
    in_dim = ob_dim
    for _ in range(n_layers):
        mlp.append((xavier_t(in_dim, hidden), lin_bias(in_dim, hidden)))
        in_dim = hidden
    params["mlp"] = mlp

    # LSTM, packed: wih/whh (H, 4H); gate COLUMN order [i | f | o | g]
    # (sigmoid gates contiguous, tanh gate last); biases pre-summed.
    b = 1.0 / (hidden ** 0.5)
    wih = jax.random.uniform(next(keys), (hidden, 4 * hidden), jnp.float32, -b, b)
    whh = jax.random.uniform(next(keys), (hidden, 4 * hidden), jnp.float32, -b, b)
    bih = jax.random.uniform(next(keys), (1, 4 * hidden), jnp.float32, -b, b)
    bhh = jax.random.uniform(next(keys), (1, 4 * hidden), jnp.float32, -b, b)
    params["lstm"] = {"wih": wih, "whh": whh, "b": bih + bhh}

    # Heads, packed lane-dense:
    #   layer-1 concatenated and zero-padded to 128 output lanes,
    #   layer-2 block-diagonal into the packed output slab
    #   [logits(ac_dim) | value(1) | h_n(H) | c_n(H) | pad],
    #   plus permutation matrices Ph/Pc that route h_n/c_n into the slab.
    off_h = ac_dim + 1
    off_c = off_h + hidden
    out_pad = _round_up(off_c + hidden, 128)
    head_pad = _round_up(2 * hidden, 128)

    wa1, ba1 = xavier_t(hidden, hidden), lin_bias(hidden, hidden)
    wc1, bc1 = xavier_t(hidden, hidden), lin_bias(hidden, hidden)
    wa2, ba2 = xavier_t(hidden, ac_dim), lin_bias(hidden, ac_dim)
    wc2, bc2 = xavier_t(hidden, 1), lin_bias(hidden, 1)

    w1 = jnp.zeros((hidden, head_pad), jnp.float32)
    w1 = w1.at[:, :hidden].set(wa1).at[:, hidden:2 * hidden].set(wc1)
    b1 = jnp.zeros((1, head_pad), jnp.float32)
    b1 = b1.at[:, :hidden].set(ba1).at[:, hidden:2 * hidden].set(bc1)

    w2 = jnp.zeros((head_pad, out_pad), jnp.float32)
    w2 = w2.at[:hidden, :ac_dim].set(wa2)
    w2 = w2.at[hidden:2 * hidden, ac_dim:ac_dim + 1].set(wc2)
    b2 = jnp.zeros((1, out_pad), jnp.float32)
    b2 = b2.at[:, :ac_dim].set(ba2).at[:, ac_dim:ac_dim + 1].set(bc2)

    eye = jnp.eye(hidden, dtype=jnp.float32)
    ph = jnp.zeros((hidden, out_pad), jnp.float32).at[:, off_h:off_h + hidden].set(eye)
    pc = jnp.zeros((hidden, out_pad), jnp.float32).at[:, off_c:off_c + hidden].set(eye)

    params["heads"] = {"w1": w1, "b1": b1, "w2": w2, "b2": b2, "ph": ph, "pc": pc}
    return params


# ---------------------------------------------------------------------------
# Pure-JAX reference (same packed weights / gate order) for a sanity check.
# ---------------------------------------------------------------------------
def _reference_forward(params, ts_ob_no, ac_dim):
    T, B, ob_dim = ts_ob_no.shape
    H = params["lstm"]["whh"].shape[0]
    h = ts_ob_no.reshape(T * B, ob_dim)
    for (w, b) in params["mlp"]:
        h = jnp.maximum(h @ w + b, 0.0)
    xg = h @ params["lstm"]["wih"] + params["lstm"]["b"]
    hh = jnp.zeros((B, H), jnp.float32)
    cc = jnp.zeros((B, H), jnp.float32)
    for t in range(T):
        g = xg[t * B:(t + 1) * B] + hh @ params["lstm"]["whh"]
        i_g = jax.nn.sigmoid(g[:, :H])
        f_g = jax.nn.sigmoid(g[:, H:2 * H])
        o_g = jax.nn.sigmoid(g[:, 2 * H:3 * H])
        g_g = jnp.tanh(g[:, 3 * H:])
        cc = f_g * cc + i_g * g_g
        hh = o_g * jnp.tanh(cc)
    a = jnp.maximum(hh @ params["heads"]["w1"] + params["heads"]["b1"], 0.0)
    out = a @ params["heads"]["w2"] + params["heads"]["b2"]
    return out[:, :ac_dim], out[:, ac_dim:ac_dim + 1], hh, cc


# ---------------------------------------------------------------------------
if __name__ == "__main__":
    OB_DIM, AC_DIM, HIDDEN, N_LAYERS = 12, 6, 32, 2
    T, B = 8, 8  # T == B so the reference's size(0)-based zero state is consistent

    root = jax.random.PRNGKey(0)
    k_params, k_x = jax.random.split(root)
    params = init_params(k_params, OB_DIM, AC_DIM, HIDDEN, N_LAYERS)
    ts_ob_no = jax.random.normal(k_x, (T, B, OB_DIM), jnp.float32)

    logits, val, (h_n, c_n) = agent_net_forward(params, ts_ob_no, ac_dim=AC_DIM)
    jax.block_until_ready((logits, val, h_n, c_n))

    assert logits.shape == (B, AC_DIM)
    assert val.shape == (B, 1)
    assert h_n.shape == (1, B, HIDDEN) and c_n.shape == (1, B, HIDDEN)

    # numerical sanity check against a pure-JAX reference
    r_logits, r_val, r_h, r_c = _reference_forward(params, ts_ob_no, AC_DIM)
    ok = (jnp.allclose(logits, r_logits, rtol=2e-2, atol=2e-2)
          & jnp.allclose(val, r_val, rtol=2e-2, atol=2e-2)
          & jnp.allclose(h_n[0], r_h, rtol=2e-2, atol=2e-2)
          & jnp.allclose(c_n[0], r_c, rtol=2e-2, atol=2e-2))
    assert bool(ok), "kernel output mismatch vs pure-JAX reference"

    print("KERNEL_OK")
</pallas_src>

<mosaic_0001>
module attributes {stable_mosaic.version = 11 : i64} {
  func.func @kernel(%arg0: memref<64x12xf32, #tpu.memory_space<vmem>>, %arg1: memref<8x32xf32, #tpu.memory_space<vmem>>, %arg2: memref<8x32xf32, #tpu.memory_space<vmem>>, %arg3: memref<12x32xf32, #tpu.memory_space<vmem>>, %arg4: memref<1x32xf32, #tpu.memory_space<vmem>>, %arg5: memref<32x32xf32, #tpu.memory_space<vmem>>, %arg6: memref<1x32xf32, #tpu.memory_space<vmem>>, %arg7: memref<32x128xf32, #tpu.memory_space<vmem>>, %arg8: memref<32x128xf32, #tpu.memory_space<vmem>>, %arg9: memref<1x128xf32, #tpu.memory_space<vmem>>, %arg10: memref<32x128xf32, #tpu.memory_space<vmem>>, %arg11: memref<1x128xf32, #tpu.memory_space<vmem>>, %arg12: memref<128x128xf32, #tpu.memory_space<vmem>>, %arg13: memref<1x128xf32, #tpu.memory_space<vmem>>, %arg14: memref<32x128xf32, #tpu.memory_space<vmem>>, %arg15: memref<32x128xf32, #tpu.memory_space<vmem>>, %arg16: memref<8x128xf32, #tpu.memory_space<vmem>>) attributes {dimension_semantics = [], scalar_prefetch = 0 : i64, scratch_operands = 0 : i64, tpu.core_type = #tpu.core_type<tc>} {
    %c0 = arith.constant 0 : index
    %c0_0 = arith.constant 0 : index
    %0 = vector.load %arg0[%c0, %c0_0] : memref<64x12xf32, #tpu.memory_space<vmem>>, vector<64x12xf32>
    %c0_1 = arith.constant 0 : index
    %c0_2 = arith.constant 0 : index
    %1 = vector.load %arg3[%c0_1, %c0_2] : memref<12x32xf32, #tpu.memory_space<vmem>>, vector<12x32xf32>
    %c0_3 = arith.constant 0 : index
    %c0_4 = arith.constant 0 : index
    %2 = vector.load %arg4[%c0_3, %c0_4] : memref<1x32xf32, #tpu.memory_space<vmem>>, vector<1x32xf32>
    %cst = arith.constant dense<0.000000e+00> : vector<64x32xf32>
    %3 = tpu.matmul %0, %1, %cst {dimension_numbers = #tpu.dot_dimension_numbers<[1], [0], [0], [1], [0, 0, 1, 1], [], []>} : vector<64x12xf32>, vector<12x32xf32>, vector<64x32xf32> -> vector<64x32xf32>
    %4 = vector.broadcast %2 : vector<1x32xf32> to vector<64x32xf32>
    %5 = arith.addf %3, %4 : vector<64x32xf32>
    %cst_5 = arith.constant 0.000000e+00 : f32
    %6 = vector.broadcast %cst_5 : f32 to vector<64x32xf32>
    %7 = arith.maximumf %5, %6 : vector<64x32xf32>
    %c0_6 = arith.constant 0 : index
    %c0_7 = arith.constant 0 : index
    %8 = vector.load %arg5[%c0_6, %c0_7] : memref<32x32xf32, #tpu.memory_space<vmem>>, vector<32x32xf32>
    %c0_8 = arith.constant 0 : index
    %c0_9 = arith.constant 0 : index
    %9 = vector.load %arg6[%c0_8, %c0_9] : memref<1x32xf32, #tpu.memory_space<vmem>>, vector<1x32xf32>
    %cst_10 = arith.constant dense<0.000000e+00> : vector<64x32xf32>
    %10 = tpu.matmul %7, %8, %cst_10 {dimension_numbers = #tpu.dot_dimension_numbers<[1], [0], [0], [1], [0, 0, 1, 1], [], []>} : vector<64x32xf32>, vector<32x32xf32>, vector<64x32xf32> -> vector<64x32xf32>
    %11 = vector.broadcast %9 : vector<1x32xf32> to vector<64x32xf32>
    %12 = arith.addf %10, %11 : vector<64x32xf32>
    %cst_11 = arith.constant 0.000000e+00 : f32
    %13 = vector.broadcast %cst_11 : f32 to vector<64x32xf32>
    %14 = arith.maximumf %12, %13 : vector<64x32xf32>
    %c0_12 = arith.constant 0 : index
    %c0_13 = arith.constant 0 : index
    %15 = vector.load %arg7[%c0_12, %c0_13] : memref<32x128xf32, #tpu.memory_space<vmem>>, vector<32x128xf32>
    %cst_14 = arith.constant dense<0.000000e+00> : vector<64x128xf32>
    %16 = tpu.matmul %14, %15, %cst_14 {dimension_numbers = #tpu.dot_dimension_numbers<[1], [0], [0], [1], [0, 0, 1, 1], [], []>} : vector<64x32xf32>, vector<32x128xf32>, vector<64x128xf32> -> vector<64x128xf32>
    %c0_15 = arith.constant 0 : index
    %c0_16 = arith.constant 0 : index
    %17 = vector.load %arg9[%c0_15, %c0_16] : memref<1x128xf32, #tpu.memory_space<vmem>>, vector<1x128xf32>
    %18 = vector.broadcast %17 : vector<1x128xf32> to vector<64x128xf32>
    %19 = arith.addf %16, %18 : vector<64x128xf32>
    %c0_17 = arith.constant 0 : index
    %c0_18 = arith.constant 0 : index
    %20 = vector.load %arg8[%c0_17, %c0_18] : memref<32x128xf32, #tpu.memory_space<vmem>>, vector<32x128xf32>
    %c0_19 = arith.constant 0 : index
    %c0_20 = arith.constant 0 : index
    %21 = vector.load %arg1[%c0_19, %c0_20] : memref<8x32xf32, #tpu.memory_space<vmem>>, vector<8x32xf32>
    %c0_21 = arith.constant 0 : index
    %c0_22 = arith.constant 0 : index
    %22 = vector.load %arg2[%c0_21, %c0_22] : memref<8x32xf32, #tpu.memory_space<vmem>>, vector<8x32xf32>
    %23 = vector.extract_strided_slice %19 {offsets = [0, 0], sizes = [8, 128], strides = [1, 1]} : vector<64x128xf32> to vector<8x128xf32>
    %cst_23 = arith.constant dense<0.000000e+00> : vector<8x128xf32>
    %24 = tpu.matmul %21, %20, %cst_23 {dimension_numbers = #tpu.dot_dimension_numbers<[1], [0], [0], [1], [0, 0, 1, 1], [], []>} : vector<8x32xf32>, vector<32x128xf32>, vector<8x128xf32> -> vector<8x128xf32>
    %25 = arith.addf %23, %24 : vector<8x128xf32>
    %26 = arith.negf %25 : vector<8x128xf32>
    %27 = math.exp %26 : vector<8x128xf32>
    %cst_24 = arith.constant 1.000000e+00 : f32
    %28 = vector.broadcast %cst_24 : f32 to vector<8x128xf32>
    %29 = arith.addf %28, %27 : vector<8x128xf32>
    %30 = arith.divf %28, %29 : vector<8x128xf32>
    %31 = vector.extract_strided_slice %30 {offsets = [0, 0], sizes = [8, 32], strides = [1, 1]} : vector<8x128xf32> to vector<8x32xf32>
    %32 = vector.extract_strided_slice %30 {offsets = [0, 32], sizes = [8, 32], strides = [1, 1]} : vector<8x128xf32> to vector<8x32xf32>
    %33 = vector.extract_strided_slice %30 {offsets = [0, 64], sizes = [8, 32], strides = [1, 1]} : vector<8x128xf32> to vector<8x32xf32>
    %34 = vector.extract_strided_slice %25 {offsets = [0, 96], sizes = [8, 32], strides = [1, 1]} : vector<8x128xf32> to vector<8x32xf32>
    %35 = math.tanh %34 : vector<8x32xf32>
    %36 = arith.mulf %32, %22 : vector<8x32xf32>
    %37 = arith.mulf %31, %35 : vector<8x32xf32>
    %38 = arith.addf %36, %37 : vector<8x32xf32>
    %39 = math.tanh %38 : vector<8x32xf32>
    %40 = arith.mulf %33, %39 : vector<8x32xf32>
    %41 = vector.extract_strided_slice %19 {offsets = [8, 0], sizes = [8, 128], strides = [1, 1]} : vector<64x128xf32> to vector<8x128xf32>
    %cst_25 = arith.constant dense<0.000000e+00> : vector<8x128xf32>
    %42 = tpu.matmul %40, %20, %cst_25 {dimension_numbers = #tpu.dot_dimension_numbers<[1], [0], [0], [1], [0, 0, 1, 1], [], []>} : vector<8x32xf32>, vector<32x128xf32>, vector<8x128xf32> -> vector<8x128xf32>
    %43 = arith.addf %41, %42 : vector<8x128xf32>
    %44 = arith.negf %43 : vector<8x128xf32>
    %45 = math.exp %44 : vector<8x128xf32>
    %cst_26 = arith.constant 1.000000e+00 : f32
    %46 = vector.broadcast %cst_26 : f32 to vector<8x128xf32>
    %47 = arith.addf %46, %45 : vector<8x128xf32>
    %48 = arith.divf %46, %47 : vector<8x128xf32>
    %49 = vector.extract_strided_slice %48 {offsets = [0, 0], sizes = [8, 32], strides = [1, 1]} : vector<8x128xf32> to vector<8x32xf32>
    %50 = vector.extract_strided_slice %48 {offsets = [0, 32], sizes = [8, 32], strides = [1, 1]} : vector<8x128xf32> to vector<8x32xf32>
    %51 = vector.extract_strided_slice %48 {offsets = [0, 64], sizes = [8, 32], strides = [1, 1]} : vector<8x128xf32> to vector<8x32xf32>
    %52 = vector.extract_strided_slice %43 {offsets = [0, 96], sizes = [8, 32], strides = [1, 1]} : vector<8x128xf32> to vector<8x32xf32>
    %53 = math.tanh %52 : vector<8x32xf32>
    %54 = arith.mulf %50, %38 : vector<8x32xf32>
    %55 = arith.mulf %49, %53 : vector<8x32xf32>
    %56 = arith.addf %54, %55 : vector<8x32xf32>
    %57 = math.tanh %56 : vector<8x32xf32>
    %58 = arith.mulf %51, %57 : vector<8x32xf32>
    %59 = vector.extract_strided_slice %19 {offsets = [16, 0], sizes = [8, 128], strides = [1, 1]} : vector<64x128xf32> to vector<8x128xf32>
    %cst_27 = arith.constant dense<0.000000e+00> : vector<8x128xf32>
    %60 = tpu.matmul %58, %20, %cst_27 {dimension_numbers = #tpu.dot_dimension_numbers<[1], [0], [0], [1], [0, 0, 1, 1], [], []>} : vector<8x32xf32>, vector<32x128xf32>, vector<8x128xf32> -> vector<8x128xf32>
    %61 = arith.addf %59, %60 : vector<8x128xf32>
    %62 = arith.negf %61 : vector<8x128xf32>
    %63 = math.exp %62 : vector<8x128xf32>
    %cst_28 = arith.constant 1.000000e+00 : f32
    %64 = vector.broadcast %cst_28 : f32 to vector<8x128xf32>
    %65 = arith.addf %64, %63 : vector<8x128xf32>
    %66 = arith.divf %64, %65 : vector<8x128xf32>
    %67 = vector.extract_strided_slice %66 {offsets = [0, 0], sizes = [8, 32], strides = [1, 1]} : vector<8x128xf32> to vector<8x32xf32>
    %68 = vector.extract_strided_slice %66 {offsets = [0, 32], sizes = [8, 32], strides = [1, 1]} : vector<8x128xf32> to vector<8x32xf32>
    %69 = vector.extract_strided_slice %66 {offsets = [0, 64], sizes = [8, 32], strides = [1, 1]} : vector<8x128xf32> to vector<8x32xf32>
    %70 = vector.extract_strided_slice %61 {offsets = [0, 96], sizes = [8, 32], strides = [1, 1]} : vector<8x128xf32> to vector<8x32xf32>
    %71 = math.tanh %70 : vector<8x32xf32>
    %72 = arith.mulf %68, %56 : vector<8x32xf32>
    %73 = arith.mulf %67, %71 : vector<8x32xf32>
    %74 = arith.addf %72, %73 : vector<8x32xf32>
    %75 = math.tanh %74 : vector<8x32xf32>
    %76 = arith.mulf %69, %75 : vector<8x32xf32>
    %77 = vector.extract_strided_slice %19 {offsets = [24, 0], sizes = [8, 128], strides = [1, 1]} : vector<64x128xf32> to vector<8x128xf32>
    %cst_29 = arith.constant dense<0.000000e+00> : vector<8x128xf32>
    %78 = tpu.matmul %76, %20, %cst_29 {dimension_numbers = #tpu.dot_dimension_numbers<[1], [0], [0], [1], [0, 0, 1, 1], [], []>} : vector<8x32xf32>, vector<32x128xf32>, vector<8x128xf32> -> vector<8x128xf32>
    %79 = arith.addf %77, %78 : vector<8x128xf32>
    %80 = arith.negf %79 : vector<8x128xf32>
    %81 = math.exp %80 : vector<8x128xf32>
    %cst_30 = arith.constant 1.000000e+00 : f32
    %82 = vector.broadcast %cst_30 : f32 to vector<8x128xf32>
    %83 = arith.addf %82, %81 : vector<8x128xf32>
    %84 = arith.divf %82, %83 : vector<8x128xf32>
    %85 = vector.extract_strided_slice %84 {offsets = [0, 0], sizes = [8, 32], strides = [1, 1]} : vector<8x128xf32> to vector<8x32xf32>
    %86 = vector.extract_strided_slice %84 {offsets = [0, 32], sizes = [8, 32], strides = [1, 1]} : vector<8x128xf32> to vector<8x32xf32>
    %87 = vector.extract_strided_slice %84 {offsets = [0, 64], sizes = [8, 32], strides = [1, 1]} : vector<8x128xf32> to vector<8x32xf32>
    %88 = vector.extract_strided_slice %79 {offsets = [0, 96], sizes = [8, 32], strides = [1, 1]} : vector<8x128xf32> to vector<8x32xf32>
    %89 = math.tanh %88 : vector<8x32xf32>
    %90 = arith.mulf %86, %74 : vector<8x32xf32>
    %91 = arith.mulf %85, %89 : vector<8x32xf32>
    %92 = arith.addf %90, %91 : vector<8x32xf32>
    %93 = math.tanh %92 : vector<8x32xf32>
    %94 = arith.mulf %87, %93 : vector<8x32xf32>
    %95 = vector.extract_strided_slice %19 {offsets = [32, 0], sizes = [8, 128], strides = [1, 1]} : vector<64x128xf32> to vector<8x128xf32>
    %cst_31 = arith.constant dense<0.000000e+00> : vector<8x128xf32>
    %96 = tpu.matmul %94, %20, %cst_31 {dimension_numbers = #tpu.dot_dimension_numbers<[1], [0], [0], [1], [0, 0, 1, 1], [], []>} : vector<8x32xf32>, vector<32x128xf32>, vector<8x128xf32> -> vector<8x128xf32>
    %97 = arith.addf %95, %96 : vector<8x128xf32>
    %98 = arith.negf %97 : vector<8x128xf32>
    %99 = math.exp %98 : vector<8x128xf32>
    %cst_32 = arith.constant 1.000000e+00 : f32
    %100 = vector.broadcast %cst_32 : f32 to vector<8x128xf32>
    %101 = arith.addf %100, %99 : vector<8x128xf32>
    %102 = arith.divf %100, %101 : vector<8x128xf32>
    %103 = vector.extract_strided_slice %102 {offsets = [0, 0], sizes = [8, 32], strides = [1, 1]} : vector<8x128xf32> to vector<8x32xf32>
    %104 = vector.extract_strided_slice %102 {offsets = [0, 32], sizes = [8, 32], strides = [1, 1]} : vector<8x128xf32> to vector<8x32xf32>
    %105 = vector.extract_strided_slice %102 {offsets = [0, 64], sizes = [8, 32], strides = [1, 1]} : vector<8x128xf32> to vector<8x32xf32>
    %106 = vector.extract_strided_slice %97 {offsets = [0, 96], sizes = [8, 32], strides = [1, 1]} : vector<8x128xf32> to vector<8x32xf32>
    %107 = math.tanh %106 : vector<8x32xf32>
    %108 = arith.mulf %104, %92 : vector<8x32xf32>
    %109 = arith.mulf %103, %107 : vector<8x32xf32>
    %110 = arith.addf %108, %109 : vector<8x32xf32>
    %111 = math.tanh %110 : vector<8x32xf32>
    %112 = arith.mulf %105, %111 : vector<8x32xf32>
    %113 = vector.extract_strided_slice %19 {offsets = [40, 0], sizes = [8, 128], strides = [1, 1]} : vector<64x128xf32> to vector<8x128xf32>
    %cst_33 = arith.constant dense<0.000000e+00> : vector<8x128xf32>
    %114 = tpu.matmul %112, %20, %cst_33 {dimension_numbers = #tpu.dot_dimension_numbers<[1], [0], [0], [1], [0, 0, 1, 1], [], []>} : vector<8x32xf32>, vector<32x128xf32>, vector<8x128xf32> -> vector<8x128xf32>
    %115 = arith.addf %113, %114 : vector<8x128xf32>
    %116 = arith.negf %115 : vector<8x128xf32>
    %117 = math.exp %116 : vector<8x128xf32>
    %cst_34 = arith.constant 1.000000e+00 : f32
    %118 = vector.broadcast %cst_34 : f32 to vector<8x128xf32>
    %119 = arith.addf %118, %117 : vector<8x128xf32>
    %120 = arith.divf %118, %119 : vector<8x128xf32>
    %121 = vector.extract_strided_slice %120 {offsets = [0, 0], sizes = [8, 32], strides = [1, 1]} : vector<8x128xf32> to vector<8x32xf32>
    %122 = vector.extract_strided_slice %120 {offsets = [0, 32], sizes = [8, 32], strides = [1, 1]} : vector<8x128xf32> to vector<8x32xf32>
    %123 = vector.extract_strided_slice %120 {offsets = [0, 64], sizes = [8, 32], strides = [1, 1]} : vector<8x128xf32> to vector<8x32xf32>
    %124 = vector.extract_strided_slice %115 {offsets = [0, 96], sizes = [8, 32], strides = [1, 1]} : vector<8x128xf32> to vector<8x32xf32>
    %125 = math.tanh %124 : vector<8x32xf32>
    %126 = arith.mulf %122, %110 : vector<8x32xf32>
    %127 = arith.mulf %121, %125 : vector<8x32xf32>
    %128 = arith.addf %126, %127 : vector<8x32xf32>
    %129 = math.tanh %128 : vector<8x32xf32>
    %130 = arith.mulf %123, %129 : vector<8x32xf32>
    %131 = vector.extract_strided_slice %19 {offsets = [48, 0], sizes = [8, 128], strides = [1, 1]} : vector<64x128xf32> to vector<8x128xf32>
    %cst_35 = arith.constant dense<0.000000e+00> : vector<8x128xf32>
    %132 = tpu.matmul %130, %20, %cst_35 {dimension_numbers = #tpu.dot_dimension_numbers<[1], [0], [0], [1], [0, 0, 1, 1], [], []>} : vector<8x32xf32>, vector<32x128xf32>, vector<8x128xf32> -> vector<8x128xf32>
    %133 = arith.addf %131, %132 : vector<8x128xf32>
    %134 = arith.negf %133 : vector<8x128xf32>
    %135 = math.exp %134 : vector<8x128xf32>
    %cst_36 = arith.constant 1.000000e+00 : f32
    %136 = vector.broadcast %cst_36 : f32 to vector<8x128xf32>
    %137 = arith.addf %136, %135 : vector<8x128xf32>
    %138 = arith.divf %136, %137 : vector<8x128xf32>
    %139 = vector.extract_strided_slice %138 {offsets = [0, 0], sizes = [8, 32], strides = [1, 1]} : vector<8x128xf32> to vector<8x32xf32>
    %140 = vector.extract_strided_slice %138 {offsets = [0, 32], sizes = [8, 32], strides = [1, 1]} : vector<8x128xf32> to vector<8x32xf32>
    %141 = vector.extract_strided_slice %138 {offsets = [0, 64], sizes = [8, 32], strides = [1, 1]} : vector<8x128xf32> to vector<8x32xf32>
    %142 = vector.extract_strided_slice %133 {offsets = [0, 96], sizes = [8, 32], strides = [1, 1]} : vector<8x128xf32> to vector<8x32xf32>
    %143 = math.tanh %142 : vector<8x32xf32>
    %144 = arith.mulf %140, %128 : vector<8x32xf32>
    %145 = arith.mulf %139, %143 : vector<8x32xf32>
    %146 = arith.addf %144, %145 : vector<8x32xf32>
    %147 = math.tanh %146 : vector<8x32xf32>
    %148 = arith.mulf %141, %147 : vector<8x32xf32>
    %149 = vector.extract_strided_slice %19 {offsets = [56, 0], sizes = [8, 128], strides = [1, 1]} : vector<64x128xf32> to vector<8x128xf32>
    %cst_37 = arith.constant dense<0.000000e+00> : vector<8x128xf32>
    %150 = tpu.matmul %148, %20, %cst_37 {dimension_numbers = #tpu.dot_dimension_numbers<[1], [0], [0], [1], [0, 0, 1, 1], [], []>} : vector<8x32xf32>, vector<32x128xf32>, vector<8x128xf32> -> vector<8x128xf32>
    %151 = arith.addf %149, %150 : vector<8x128xf32>
    %152 = arith.negf %151 : vector<8x128xf32>
    %153 = math.exp %152 : vector<8x128xf32>
    %cst_38 = arith.constant 1.000000e+00 : f32
    %154 = vector.broadcast %cst_38 : f32 to vector<8x128xf32>
    %155 = arith.addf %154, %153 : vector<8x128xf32>
    %156 = arith.divf %154, %155 : vector<8x128xf32>
    %157 = vector.extract_strided_slice %156 {offsets = [0, 0], sizes = [8, 32], strides = [1, 1]} : vector<8x128xf32> to vector<8x32xf32>
    %158 = vector.extract_strided_slice %156 {offsets = [0, 32], sizes = [8, 32], strides = [1, 1]} : vector<8x128xf32> to vector<8x32xf32>
    %159 = vector.extract_strided_slice %156 {offsets = [0, 64], sizes = [8, 32], strides = [1, 1]} : vector<8x128xf32> to vector<8x32xf32>
    %160 = vector.extract_strided_slice %151 {offsets = [0, 96], sizes = [8, 32], strides = [1, 1]} : vector<8x128xf32> to vector<8x32xf32>
    %161 = math.tanh %160 : vector<8x32xf32>
    %162 = arith.mulf %158, %146 : vector<8x32xf32>
    %163 = arith.mulf %157, %161 : vector<8x32xf32>
    %164 = arith.addf %162, %163 : vector<8x32xf32>
    %165 = math.tanh %164 : vector<8x32xf32>
    %166 = arith.mulf %159, %165 : vector<8x32xf32>
    %c0_39 = arith.constant 0 : index
    %c0_40 = arith.constant 0 : index
    %167 = vector.load %arg10[%c0_39, %c0_40] : memref<32x128xf32, #tpu.memory_space<vmem>>, vector<32x128xf32>
    %cst_41 = arith.constant dense<0.000000e+00> : vector<8x128xf32>
    %168 = tpu.matmul %166, %167, %cst_41 {dimension_numbers = #tpu.dot_dimension_numbers<[1], [0], [0], [1], [0, 0, 1, 1], [], []>} : vector<8x32xf32>, vector<32x128xf32>, vector<8x128xf32> -> vector<8x128xf32>
    %c0_42 = arith.constant 0 : index
    %c0_43 = arith.constant 0 : index
    %169 = vector.load %arg11[%c0_42, %c0_43] : memref<1x128xf32, #tpu.memory_space<vmem>>, vector<1x128xf32>
    %170 = vector.broadcast %169 : vector<1x128xf32> to vector<8x128xf32>
    %171 = arith.addf %168, %170 : vector<8x128xf32>
    %cst_44 = arith.constant 0.000000e+00 : f32
    %172 = vector.broadcast %cst_44 : f32 to vector<8x128xf32>
    %173 = arith.maximumf %171, %172 : vector<8x128xf32>
    %c0_45 = arith.constant 0 : index
    %c0_46 = arith.constant 0 : index
    %174 = vector.load %arg12[%c0_45, %c0_46] : memref<128x128xf32, #tpu.memory_space<vmem>>, vector<128x128xf32>
    %cst_47 = arith.constant dense<0.000000e+00> : vector<8x128xf32>
    %175 = tpu.matmul %173, %174, %cst_47 {dimension_numbers = #tpu.dot_dimension_numbers<[1], [0], [0], [1], [0, 0, 1, 1], [], []>} : vector<8x128xf32>, vector<128x128xf32>, vector<8x128xf32> -> vector<8x128xf32>
    %c0_48 = arith.constant 0 : index
    %c0_49 = arith.constant 0 : index
    %176 = vector.load %arg13[%c0_48, %c0_49] : memref<1x128xf32, #tpu.memory_space<vmem>>, vector<1x128xf32>
    %177 = vector.broadcast %176 : vector<1x128xf32> to vector<8x128xf32>
    %178 = arith.addf %175, %177 : vector<8x128xf32>
    %c0_50 = arith.constant 0 : index
    %c0_51 = arith.constant 0 : index
    %179 = vector.load %arg14[%c0_50, %c0_51] : memref<32x128xf32, #tpu.memory_space<vmem>>, vector<32x128xf32>
    %cst_52 = arith.constant dense<0.000000e+00> : vector<8x128xf32>
    %180 = tpu.matmul %166, %179, %cst_52 {dimension_numbers = #tpu.dot_dimension_numbers<[1], [0], [0], [1], [0, 0, 1, 1], [], []>} : vector<8x32xf32>, vector<32x128xf32>, vector<8x128xf32> -> vector<8x128xf32>
    %181 = arith.addf %178, %180 : vector<8x128xf32>
    %c0_53 = arith.constant 0 : index
    %c0_54 = arith.constant 0 : index
    %182 = vector.load %arg15[%c0_53, %c0_54] : memref<32x128xf32, #tpu.memory_space<vmem>>, vector<32x128xf32>
    %cst_55 = arith.constant dense<0.000000e+00> : vector<8x128xf32>
    %183 = tpu.matmul %164, %182, %cst_55 {dimension_numbers = #tpu.dot_dimension_numbers<[1], [0], [0], [1], [0, 0, 1, 1], [], []>} : vector<8x32xf32>, vector<32x128xf32>, vector<8x128xf32> -> vector<8x128xf32>
    %184 = arith.addf %181, %183 : vector<8x128xf32>
    %c0_56 = arith.constant 0 : index
    %c0_57 = arith.constant 0 : index
    %185 = vector.load %arg16[%c0_56, %c0_57] : memref<8x128xf32, #tpu.memory_space<vmem>>, vector<8x128xf32>
    tpu.vector_store %arg16[%c0_56, %c0_57], %184 {strides = array<i32>} : memref<8x128xf32, #tpu.memory_space<vmem>>, vector<8x128xf32>,
    return
  }
}

</mosaic_0001>

<bundles_post_ra>
// kernel: agent_net_forward.1
= control target key start
LH: loop header
LB: loop body
LE: loop exit
PB: predicated region body
PF: predicated region fallthrough
CT: control target
= control target key end

     0   :  { %s2785_s0 = inlined_call_operand.hbm [shape: f32[64,12], index: 0, kind: input, shape index: {}]   ;;  %s2786_s1 = inlined_call_operand.vmem [shape: f32[8,32], index: 1, kind: input, shape index: {}, may-alias: {1,2}]   ;;  %s2787_s2 = inlined_call_operand.vmem [shape: f32[8,32], index: 2, kind: input, shape index: {}, may-alias: {1,2}]   ;;  %s2788_s3 = inlined_call_operand.vmem [shape: f32[12,32], index: 3, kind: input, shape index: {}]   ;;  %s2789_s4 = inlined_call_operand.vmem [shape: f32[1,32], index: 4, kind: input, shape index: {}]   ;;  %s2790_s5 = inlined_call_operand.hbm [shape: f32[32,32], index: 5, kind: input, shape index: {}]   ;;  %s2791_s6 = inlined_call_operand.vmem [shape: f32[1,32], index: 6, kind: input, shape index: {}]   ;;  %s2792_s7 = inlined_call_operand.hbm [shape: f32[32,128], index: 7, kind: input, shape index: {}]   ;;  %s2793_s8 = inlined_call_operand.hbm [shape: f32[32,128], index: 8, kind: input, shape index: {}]   ;;  %s2794_s9 = inlined_call_operand.vmem [shape: f32[1,128], index: 9, kind: input, shape index: {}]   ;;  %s2795_s10 = inlined_call_operand.hbm [shape: f32[32,128], index: 10, kind: input, shape index: {}]   ;;  %s2796_s11 = inlined_call_operand.vmem [shape: f32[1,128], index: 11, kind: input, shape index: {}]   ;;  %s2797_s12 = inlined_call_operand.hbm [shape: f32[128,128], index: 12, kind: input, shape index: {}]   ;;  %s2798_s13 = inlined_call_operand.vmem [shape: f32[1,128], index: 13, kind: input, shape index: {}]   ;;  %s2799_s14 = inlined_call_operand.hbm [shape: f32[32,128], index: 14, kind: input, shape index: {}]   ;;  %s2800_s15 = inlined_call_operand.hbm [shape: f32[32,128], index: 15, kind: input, shape index: {}]   ;;  %s2801_s16 = inlined_call_operand.vmem [shape: f32[8,128], index: 16, kind: output, shape index: {}]  }
   0x1   :  { %2802 = sst [smem:[#allocation20_spill]] %s2785_s0 }
   0x2   :  { %21 = vsyncpa [#allocation3], 0 }
   0x3   :  { %22 = vsyncpa [#allocation5], 0 }
   0x4   :  { %23 = vsyncpa [#allocation8], 0 }
   0x5   :  { %24 = vsyncpa [#allocation11], 0 }
   0x6   :  { %25 = vsyncpa [#allocation14], 0  ;;  %s2387_s21 = smov [#allocation4]   ;;  %s2388_s23 = smov [#allocation7]  }
   0x7   :  { %s51_s22 = sshll.u32 %s2387_s21, 4  ;;  %s77_s24 = sshll.u32 %s2388_s23, 4  ;;  %s52_s22 = int_to_ptr.vmem [resolvable:$true] %s51_s22  ;;  %s78_s24 = int_to_ptr.vmem [resolvable:$true] %s77_s24 }
   0x8   :  { %s2225_s25 = scalar_lea.vmem %s52_s22, 512  ;;  %p2230_p1 = scmp.lt.s32.totalorder %s52_s22, %s52_s22 }
   0x9   :  { %p2226_p0 = scmp.ne.s32.totalorder %s52_s22, %s2225_s25  ;;  %p2231_p2 = scmp.lt.s32.totalorder %s2225_s25, %s2225_s25 }
   0xb   :  { %p2232_p3 = por %p2231_p2, %p2230_p1 }
   0xd   :  { %p2233_p4 = pnand %p2232_p3, %p2226_p0 }
   0xf   :  { %2236 = shalt.err (!%p2233_p4)
}
  0x10   :  { %s2389_s26 = smov 128   ;;  %s2390_s27 = smov 8  }
  0x11   :  { %57 = dma.hbm_to_vmem [thread:$0]  %s2790_s5, 512, %s52_s22, [#allocation5], %s2389_s26, %s2389_s26, %s2390_s27  }
  0x12   :  { %s2245_s30 = scalar_lea.vmem %s78_s24, 512  ;;  %p2250_p6 = scmp.lt.s32.totalorder %s78_s24, %s78_s24 }
  0x13   :  { %p2246_p5 = scmp.ne.s32.totalorder %s78_s24, %s2245_s30  ;;  %p2251_p7 = scmp.lt.s32.totalorder %s2245_s30, %s2245_s30 }
  0x15   :  { %p2252_p8 = por %p2251_p7, %p2250_p6 }
  0x17   :  { %p2253_p9 = pnand %p2252_p8, %p2246_p5 }
  0x19   :  { %2256 = shalt.err (!%p2253_p9)
}
  0x1a   :  { %83 = dma.hbm_to_vmem [thread:$0]  %s2793_s8, 512, %s78_s24, [#allocation8], %s2389_s26, %s2389_s26, %s2390_s27  }
  0x1b   :  { %s2391_s18 = smov [#allocation10]   ;;  %s2392_s20 = smov [#allocation2]  }
  0x1c   :  { %s105_s19 = sshll.u32 %s2391_s18, 4  ;;  %s31_s21 = sshll.u32 %s2392_s20, 4  ;;  %s106_s19 = int_to_ptr.vmem [resolvable:$true] %s105_s19  ;;  %s32_s21 = int_to_ptr.vmem [resolvable:$true] %s31_s21 }
  0x1d   :  { %s2265_s5 = scalar_lea.vmem %s106_s19, 2048  ;;  %p2270_p11 = scmp.lt.s32.totalorder %s106_s19, %s106_s19 }
  0x1e   :  { %p2266_p10 = scmp.ne.s32.totalorder %s106_s19, %s2265_s5  ;;  %p2271_p12 = scmp.lt.s32.totalorder %s2265_s5, %s2265_s5 }
  0x20   :  { %p2272_p13 = por %p2271_p12, %p2270_p11 }
  0x22   :  { %p2273_p0 = pnand %p2272_p13, %p2266_p10 }
  0x24   :  { %2276 = shalt.err (!%p2273_p0)
}
  0x25   :  { %111 = dma.hbm_to_vmem [thread:$0]  %s2797_s12, 2048, %s106_s19, [#allocation11], %s2389_s26, %s2389_s26, %s2390_s27  }
  0x26   :  { %s2285_s8 = scalar_lea.vmem %s32_s21, 1024  ;;  %p2290_p2 = scmp.lt.s32.totalorder %s32_s21, %s32_s21 }
  0x27   :  { %p2286_p1 = scmp.ne.s32.totalorder %s32_s21, %s2285_s8  ;;  %p2291_p3 = scmp.lt.s32.totalorder %s2285_s8, %s2285_s8 }
  0x29   :  { %p2292_p4 = por %p2291_p3, %p2290_p2 }
  0x2b   :  { %p2293_p5 = pnand %p2292_p4, %p2286_p1 }
  0x2d   :  { %2296 = shalt.err (!%p2293_p5)
}
  0x2e   :  { %s2803_s28 = sld [smem:[#allocation20_spill]]  ;;  %s2393_s29 = smov [#allocation6]  }
  0x2f   :  { %s65_s30 = sshll.u32 %s2393_s29, 4  ;;  %s2394_s0 = smov [#allocation9]   ;;  %s66_s30 = int_to_ptr.vmem [resolvable:$true] %s65_s30 }
  0x30   :  { %s91_s17 = sshll.u32 %s2394_s0, 4  ;;  %s2305_s12 = scalar_lea.vmem %s66_s30, 512  ;;  %s92_s17 = int_to_ptr.vmem [resolvable:$true] %s91_s17 }
  0x31   :  { %p2306_p6 = scmp.ne.s32.totalorder %s66_s30, %s2305_s12  ;;  %p2310_p7 = scmp.lt.s32.totalorder %s66_s30, %s66_s30 }
  0x32   :  { %p2311_p8 = scmp.lt.s32.totalorder %s2305_s12, %s2305_s12 }
  0x34   :  { %37 = dma.hbm_to_vmem [thread:$0]  %s2803_s28, 1024, %s32_s21, [#allocation3], %s2389_s26, %s2389_s26, %s2390_s27  }
  0x35   :  { %p2312_p9 = por %p2311_p8, %p2310_p7 }
  0x37   :  { %p2313_p10 = pnand %p2312_p9, %p2306_p6 }
  0x39   :  { %2316 = shalt.err (!%p2313_p10)
}
  0x3a   :  { %71 = dma.hbm_to_vmem [thread:$0]  %s2792_s7, 512, %s66_s30, [#allocation5], %s2389_s26, %s2389_s26, %s2390_s27  }
  0x3b   :  { %s2325_s20 = scalar_lea.vmem %s92_s17, 512  ;;  %p2330_p12 = scmp.lt.s32.totalorder %s92_s17, %s92_s17 }
  0x3c   :  { %p2326_p11 = scmp.ne.s32.totalorder %s92_s17, %s2325_s20  ;;  %p2331_p13 = scmp.lt.s32.totalorder %s2325_s20, %s2325_s20 }
  0x3e   :  { %p2332_p0 = por %p2331_p13, %p2330_p12 }
  0x40   :  { %p2333_p1 = pnand %p2332_p0, %p2326_p11 }
  0x42   :  { %2336 = shalt.err (!%p2333_p1)
}
  0x43   :  { %97 = dma.hbm_to_vmem [thread:$0]  %s2795_s10, 512, %s92_s17, [#allocation8], %s2389_s26, %s2389_s26, %s2390_s27  }
  0x44   :  { %s2395_s22 = smov [#allocation12]   ;;  %s2396_s8 = smov [#allocation13]  }
  0x45   :  { %s119_s23 = sshll.u32 %s2395_s22, 4  ;;  %s131_s24 = sshll.u32 %s2396_s8, 4  ;;  %s120_s23 = int_to_ptr.vmem [resolvable:$true] %s119_s23  ;;  %s132_s24 = int_to_ptr.vmem [resolvable:$true] %s131_s24 }
  0x46   :  { %s2345_s7 = scalar_lea.vmem %s120_s23, 512  ;;  %p2350_p3 = scmp.lt.s32.totalorder %s120_s23, %s120_s23 }
  0x47   :  { %p2346_p2 = scmp.ne.s32.totalorder %s120_s23, %s2345_s7  ;;  %p2351_p4 = scmp.lt.s32.totalorder %s2345_s7, %s2345_s7 }
  0x49   :  { %p2352_p5 = por %p2351_p4, %p2350_p3 }
  0x4b   :  { %p2353_p6 = pnand %p2352_p5, %p2346_p2 }
  0x4d   :  { %2356 = shalt.err (!%p2353_p6)
}
  0x4e   :  { %125 = dma.hbm_to_vmem [thread:$0]  %s2799_s14, 512, %s120_s23, [#allocation11], %s2389_s26, %s2389_s26, %s2390_s27  }
  0x4f   :  { %s2365_s10 = scalar_lea.vmem %s132_s24, 512  ;;  %p2370_p8 = scmp.lt.s32.totalorder %s132_s24, %s132_s24 }
  0x50   :  { %p2366_p7 = scmp.ne.s32.totalorder %s132_s24, %s2365_s10  ;;  %p2371_p9 = scmp.lt.s32.totalorder %s2365_s10, %s2365_s10 }
  0x52   :  { %p2372_p10 = por %p2371_p9, %p2370_p8 }
  0x54   :  { %p2373_p11 = pnand %p2372_p10, %p2366_p7 }
  0x56   :  { %2376 = shalt.err (!%p2373_p11)
}
  0x57   :  { %137 = dma.hbm_to_vmem [thread:$0]  %s2800_s15, 512, %s132_s24, [#allocation14], %s2389_s26, %s2389_s26, %s2390_s27  }
  0x58   :  { %2377 = dma.done.wait [#allocation3], 1024  }
  0x59   :  { %2378 = vsyncadd [#allocation3], 4294966272 }
  0x5a   :  { %2379 = dma.done.wait [#allocation5], 1024  }
  0x5b   :  { %2380 = vsyncadd [#allocation5], 4294966272 }
  0x5c   :  { %2381 = dma.done.wait [#allocation8], 1024  }
  0x5d   :  { %2382 = vsyncadd [#allocation8], 4294966272 }
  0x5e   :  { %2383 = dma.done.wait [#allocation11], 2560  }
  0x5f   :  { %2384 = vsyncadd [#allocation11], 4294964736 }
  0x60   :  { %2385 = dma.done.wait [#allocation14], 512  }
  0x61   :  { %2386 = vsyncadd [#allocation14], 4294966784  ;;  %vm204_vm0 = vcmask 1043456   ;;  %vm179_vm1 = vcmask 97280   ;;  %v171_v0 = vld [vmem:[%s2788_s3 + $0x8] sm:$0xf] }
  0x62   :  { %v170_v1 = vld [vmem:[%s2788_s3] sm:$0xff]  ;;  %1918 = vmatprep.subr.msk.mxu0 %vm204_vm0, %v171_v0  ;;  %v163_v3 = vld [vmem:[#allocation2 + $0x8] sm:$0xff]  ;;  %v324_v4 = vld [vmem:[#allocation4 + $0x18] sm:$0xff]  ;;  %vm332_vm2 = vcmask 261120   ;;  %v2397_v41 = vmov 0.0   ;;  %vm2398_vm3 = vmmov 0  }
  0x63   :  { %v162_v2 = vld [vmem:[#allocation2] sm:$0xff]  ;;  %1919 = vmatpush3.msk.msra.mxu0 %vm204_vm0, %v171_v0  ;;  %v164_v5 = vld [vmem:[#allocation2 + $0x10] sm:$0xff]  ;;  %2130 = vmatprep.subr.mxu1 %v324_v4  ;;  %v165_v7 = vld [vmem:[#allocation2 + $0x18] sm:$0xff]  ;;  %s2401_s21 = smov 96  }
  0x64   :  { %1922 = vmatprep.mubr.msk.f32.mxu0 %vm179_vm1, %v162_v2  ;;  %1920 = vmatprep.subr.mxu0 %v170_v1  ;;  %v323_v6 = vld [vmem:[#allocation4 + $0x10] sm:$0xff]  ;;  %v322_v8 = vld [vmem:[#allocation4 + $0x8] sm:$0xff]  ;;  %v166_v9 = vld [vmem:[#allocation2 + $0x20] sm:$0xff] }
  0x65   :  { %1921 = vmatpush3.msra.mxu0 %v170_v1  ;;  %2134 = vmatpush3.msra.mxu1 %v324_v4  ;;  %v167_v10 = vld [vmem:[#allocation2 + $0x28] sm:$0xff]  ;;  %v168_v11 = vld [vmem:[#allocation2 + $0x30] sm:$0xff]  ;;  %v169_v12 = vld [vmem:[#allocation2 + $0x38] sm:$0xff] }
  0x66   :  { %1923 = vmatmul.mubr.msk.f32.vlgmr.msra.gmra.mxu0 %vm179_vm1, %v163_v3  ;;  %1934 = vmatprep.subr.mxu0 %v324_v4  ;;  %v321_v13 = vld [vmem:[#allocation4] sm:$0xff]  ;;  %v473_v14 = vld [vmem:[#allocation6 + $0x18] sm:$0xff]  ;;  %v472_v40 = vld [vmem:[#allocation6 + $0x10] sm:$0xff] }
  0x67   :  { %1925 = vmatprep.mubr.msk.f32.mxu0 %vm179_vm1, %v164_v5  ;;  %1935 = vmatpush3.msra.mxu0 %v324_v4  ;;  %v1763_v15 = vld [vmem:[%s2789_s4] ss:$0 sm:$0xff]  ;;  %v2561_v42 = vld [vmem:[#allocation7 + $0x18] sm:$0xff]  ;;  %v471_v43 = vld [vmem:[#allocation6 + $0x8] sm:$0xff] }
  0x68   :  { %1936 = vmatprep.subr.mxu0 %v323_v6  ;;  %2131 = vmatprep.subr.mxu1 %v323_v6  ;;  %v2565_v44 = vld [vmem:[#allocation7 + $0x10] sm:$0xff]  ;;  %v470_v45 = vld [vmem:[#allocation6] sm:$0xff]  ;;  %v2569_v46 = vld [vmem:[#allocation7 + $0x8] sm:$0xff] }
  0x69   :  { %1937 = vmatpush3.msra.mxu0 %v323_v6  ;;  %2135 = vmatpush3.msra.mxu1 %v323_v6  ;;  %v2573_v47 = vld [vmem:[#allocation7] sm:$0xff] }
  0x6a   :  { %1926 = vmatmul.mubr.msk.f32.gmra.mxu0 %vm179_vm1, %v165_v7  ;;  %1938 = vmatprep.subr.mxu0 %v322_v8  ;;  %v614_v48 = vld [vmem:[%s2786_s1] sm:$0xff] }
  0x6b   :  { %1928 = vmatprep.mubr.msk.f32.mxu0 %vm179_vm1, %v166_v9  ;;  %1939 = vmatpush3.msra.mxu0 %v322_v8  ;;  %v1773_v49 = vld [vmem:[%s2791_s6] ss:$0 sm:$0xff] }
  0x6c   :  { %2132 = vmatprep.subr.mxu1 %v322_v8  ;;  %1940 = vmatprep.subr.mxu0 %v321_v13 }
  0x6d   :  { %2136 = vmatpush3.msra.mxu1 %v322_v8  ;;  %1941 = vmatpush3.msra.mxu0 %v321_v13 }
  0x6e   :  { %1929 = vmatmul.mubr.msk.f32.gmra.mxu0 %vm179_vm1, %v167_v10  ;;  %2133 = vmatprep.subr.mxu1 %v321_v13 }
  0x6f   :  { %1931 = vmatprep.mubr.msk.f32.mxu0 %vm179_vm1, %v168_v11  ;;  %2137 = vmatpush3.msra.mxu1 %v321_v13 }
  0x70   :  { %1954 = vmatprep.subr.mxu0 %v473_v14  ;;  %1974 = vmatprep.subr.mxu1 %v2397_v41 }
  0x72   :  { %1932 = vmatmul.mubr.msk.f32.gmra.mxu0 %vm179_vm1, %v169_v12  ;;  %v2618_v12 = vld [vmem:[%s2794_s9] ss:$0 sm:$0xff]  ;;  %s2399_s9 = smov 32  }
 0x126   :  { %v1924_v16 = vpop.f32.mrf.mxu0 }
 0x127   :  { %v280_v17 = vadd.f32 %v1924_v16, %v1763_v15 }
 0x128   :  { %v274_v18 = vpop.f32.mrf.mxu0 }
 0x129   :  { %v275_v19 = vadd.f32 %v1763_v15, %v274_v18  ;;  %v314_v23 = vmax.f32 %v280_v17, 0.0 }
 0x12a   :  { %v1927_v20 = vpop.f32.mrf.mxu0 }
 0x12b   :  { %v313_v21 = vmax.f32 %v275_v19, 0.0  ;;  %v290_v22 = vadd.f32 %v1927_v20, %v1763_v15 }
 0x12c   :  { %v284_v24 = vpop.f32.mrf.mxu0 }
 0x12d   :  { %1942 = vmatprep.mubr.msk.f32.mxu0 %vm332_vm2, %v313_v21  ;;  %v285_v25 = vadd.f32 %v1763_v15, %v284_v24  ;;  %v316_v26 = vmax.f32 %v290_v22, 0.0 }
 0x12e   :  { %1943 = vmatmul.mubr.msk.f32.vlgmr.msra.gmra.mxu0 %vm332_vm2, %v314_v23  ;;  %v1930_v27 = vpop.f32.mrf.mxu0 }
 0x12f   :  { %v315_v28 = vmax.f32 %v285_v25, 0.0  ;;  %v300_v29 = vadd.f32 %v1930_v27, %v1763_v15  ;;  %1955 = vmatpush3.msra.mxu0 %v473_v14 }
 0x130   :  { %v294_v30 = vpop.f32.mrf.mxu0  ;;  %1956 = vmatprep.subr.mxu0 %v472_v40 }
 0x131   :  { %v295_v31 = vadd.f32 %v1763_v15, %v294_v30  ;;  %1945 = vmatprep.mubr.msk.f32.mxu0 %vm332_vm2, %v315_v28  ;;  %v318_v32 = vmax.f32 %v300_v29, 0.0  ;;  %1957 = vmatpush3.msra.mxu0 %v472_v40  ;;  %v615_v28 = vld [vmem:[%s2787_s2] sm:$0xff]  ;;  %s2400_s2 = smov 64  }
 0x132   :  { %v1933_v33 = vpop.f32.mrf.mxu0  ;;  %1946 = vmatmul.mubr.msk.f32.gmra.mxu0 %vm332_vm2, %v316_v26  ;;  %1958 = vmatprep.subr.mxu0 %v471_v43 }
 0x133   :  { %v317_v34 = vmax.f32 %v295_v31, 0.0  ;;  %v310_v35 = vadd.f32 %v1933_v33, %v1763_v15  ;;  %1959 = vmatpush3.msra.mxu0 %v471_v43 }
 0x134   :  { %v304_v36 = vpop.f32.mrf.mxu0  ;;  %1960 = vmatprep.subr.mxu0 %v470_v45 }
 0x135   :  { %v305_v37 = vadd.f32 %v1763_v15, %v304_v36  ;;  %1948 = vmatprep.mubr.msk.f32.mxu1 %vm332_vm2, %v317_v34  ;;  %v320_v38 = vmax.f32 %v310_v35, 0.0  ;;  %1961 = vmatpush3.msra.mxu0 %v470_v45 }
 0x136   :  { %1949 = vmatmul.mubr.msk.f32.vlgmr.msra.gmra.mxu1 %vm332_vm2, %v318_v32  ;;  %1996 = vmatprep.subr.mxu0 %v2397_v41 }
 0x137   :  { %v319_v39 = vmax.f32 %v305_v37, 0.0  ;;  %1975 = vmatpush3.msra.mxu1 %v2561_v42 }
 0x138   :  { %1976 = vmatprep.subr.mxu1 %v2397_v41 }
 0x139   :  { %1951 = vmatprep.mubr.msk.f32.mxu1 %vm332_vm2, %v319_v39  ;;  %1977 = vmatpush3.msra.mxu1 %v2565_v44 }
 0x13a   :  { %1952 = vmatmul.mubr.msk.f32.gmra.mxu1 %vm332_vm2, %v320_v38  ;;  %1978 = vmatprep.subr.mxu1 %v2397_v41 }
 0x13b   :  { %1979 = vmatpush3.msra.mxu1 %v2569_v46  ;;  %1982 = vmatprep.mubr.msk.f32.mxu1 %vm2398_vm3, %v2397_v41 }
 0x13c   :  { %1980 = vmatprep.subr.mxu1 %v2397_v41 }
 0x13d   :  { %1981 = vmatpush3.msra.mxu1 %v2573_v47 }
 0x13e   :  { %1983 = vmatmul.mubr.msk.f32.vlgmr.msra.gmra.mxu1 %vm332_vm2, %v614_v48  ;;  %1985 = vmatprep.subr.mxu1 %v2397_v41 }
 0x13f   :  { %1986 = vmatpush3.msra.mxu1 %v2561_v42  ;;  %1993 = vmatprep.mubr.msk.f32.mxu1 %vm2398_vm3, %v2397_v41 }
 0x140   :  { %1987 = vmatprep.subr.mxu1 %v2397_v41 }
 0x141   :  { %1988 = vmatpush3.msra.mxu1 %v2565_v44 }
 0x142   :  { %1989 = vmatprep.subr.mxu1 %v2397_v41 }
 0x143   :  { %1990 = vmatpush3.msra.mxu1 %v2569_v46 }
 0x144   :  { %1991 = vmatprep.subr.mxu1 %v2397_v41 }
 0x145   :  { %1992 = vmatpush3.msra.mxu1 %v2573_v47 }
 0x146   :  { %2007 = vmatprep.subr.mxu1 %v2397_v41 }
 0x1ee   :  { %v1944_v50 = vpop.f32.mrf.mxu0 }
 0x1ef   :  { %v429_v51 = vadd.f32 %v1944_v50, %v1773_v49 }
 0x1f0   :  { %v423_v52 = vpop.f32.mrf.mxu0 }
 0x1f1   :  { %v424_v53 = vadd.f32 %v1773_v49, %v423_v52  ;;  %v463_v57 = vmax.f32 %v429_v51, 0.0 }
 0x1f2   :  { %v1947_v54 = vpop.f32.mrf.mxu0 }
 0x1f3   :  { %v462_v55 = vmax.f32 %v424_v53, 0.0  ;;  %v439_v56 = vadd.f32 %v1947_v54, %v1773_v49 }
 0x1f4   :  { %v433_v58 = vpop.f32.mrf.mxu0 }
 0x1f5   :  { %1962 = vmatprep.mubr.msk.f32.mxu0 %vm332_vm2, %v462_v55  ;;  %v434_v59 = vadd.f32 %v1773_v49, %v433_v58  ;;  %v465_v60 = vmax.f32 %v439_v56, 0.0 }
 0x1f6   :  { %1963 = vmatmul.mubr.msk.f32.vlgmr.msra.gmra.mxu0 %vm332_vm2, %v463_v57  ;;  %v1950_v61 = vpop.f32.mrf.mxu1 }
 0x1f7   :  { %v464_v62 = vmax.f32 %v434_v59, 0.0  ;;  %v449_v63 = vadd.f32 %v1950_v61, %v1773_v49  ;;  %1997 = vmatpush3.msra.mxu0 %v2561_v42 }
 0x1f8   :  { %v443_v0 = vpop.f32.mrf.mxu1  ;;  %1998 = vmatprep.subr.mxu0 %v2397_v41 }
 0x1f9   :  { %v444_v1 = vadd.f32 %v1773_v49, %v443_v0  ;;  %1965 = vmatprep.mubr.msk.f32.mxu0 %vm332_vm2, %v464_v62  ;;  %1999 = vmatpush3.msra.mxu0 %v2565_v44  ;;  %v467_v2 = vmax.f32 %v449_v63, 0.0 }
 0x1fa   :  { %v1953_v3 = vpop.f32.mrf.mxu1  ;;  %1966 = vmatmul.mubr.msk.f32.gmra.mxu0 %vm332_vm2, %v465_v60  ;;  %2000 = vmatprep.subr.mxu0 %v2397_v41 }
 0x1fb   :  { %v466_v4 = vmax.f32 %v444_v1, 0.0  ;;  %v459_v5 = vadd.f32 %v1953_v3, %v1773_v49  ;;  %2001 = vmatpush3.msra.mxu0 %v2569_v46 }
 0x1fc   :  { %v453_v6 = vpop.f32.mrf.mxu1  ;;  %2002 = vmatprep.subr.mxu0 %v2397_v41 }
 0x1fd   :  { %v454_v7 = vadd.f32 %v1773_v49, %v453_v6  ;;  %1968 = vmatprep.mubr.msk.f32.mxu0 %vm332_vm2, %v466_v4  ;;  %2003 = vmatpush3.msra.mxu0 %v2573_v47  ;;  %v469_v8 = vmax.f32 %v459_v5, 0.0 }
 0x1fe   :  { %1969 = vmatmul.mubr.msk.f32.gmra.mxu0 %vm332_vm2, %v467_v2  ;;  %2018 = vmatprep.subr.mxu0 %v2397_v41  ;;  %v685_v10 = vpop.f32.mrf.mxu1 }
 0x1ff   :  { %v468_v9 = vmax.f32 %v454_v7, 0.0 }
 0x200   :  { %v1984_v11 = vpop.f32.mrf.mxu1 }
 0x201   :  { %1971 = vmatprep.mubr.msk.f32.mxu0 %vm332_vm2, %v468_v9 }
 0x202   :  { %1972 = vmatmul.mubr.msk.f32.gmra.mxu0 %vm332_vm2, %v469_v8 }
 0x203   :  { %2004 = vmatprep.mubr.msk.f32.mxu0 %vm2398_vm3, %v2397_v41 }
 0x2b6   :  { %v1964_v13 = vpop.f32.mrf.mxu0 }
 0x2b7   :  { %v577_v14 = vadd.f32 %v1964_v13, %v2618_v12 }
 0x2b8   :  { %v571_v15 = vpop.f32.mrf.mxu0 }
 0x2b9   :  { %v572_v16 = vadd.f32 %v2618_v12, %v571_v15 }
 0x2ba   :  { %v1967_v18 = vpop.f32.mrf.mxu0 }
 0x2bb   :  { %v689_v17 = vadd.f32 %v685_v10, %v572_v16  ;;  %v2623_v19 = vadd.f32 %v1967_v18, %v2618_v12 }
 0x2bc   :  { %v2625_v20 = vpop.f32.mrf.mxu0 }
 0x2bd   :  { %2153 = vtanh.f32 %v689_v17  ;;  %v1792_v29 = vmul.f32 -1.442695, %v689_v17  ;;  %v582_v2 = vadd.f32 %v2618_v12, %v2625_v20 }
 0x2be   :  { %v1970_v21 = vpop.f32.mrf.mxu0 }
 0x2bf   :  { %v2628_v22 = vadd.f32 %v1970_v21, %v2618_v12  ;;  %2155 = vpow2.f32 %v1792_v29 }
 0x2c0   :  { %v591_v23 = vpop.f32.mrf.mxu0 }
 0x2c1   :  { %v2631_v24 = vadd.f32 %v2618_v12, %v591_v23 }
 0x2c2   :  { %v1973_v26 = vpop.f32.mrf.mxu0 }
 0x2c3   :  { %v2635_v27 = vadd.f32 %v1973_v26, %v2618_v12 }
 0x2c4   :  { %v2670_v1 = vpop.f32.mrf.mxu0 }
 0x2ca   :  { %v2154_v25 = vpop.eup %2153 }
 0x2cb   :  { %703 = vrot.lane.b32.xlu0 %v2154_v25, %s2399_s9 }
 0x2cc   :  { %v2156_v30 = vpop.eup %2155 }
 0x2cd   :  { %v693_v31 = vadd.f32 1.0, %v2156_v30 }
 0x2cf   :  { %698 = vrot.lane.b32.xlu0 %v615_v28, %s2399_s9  ;;  %2157 = vrcp.f32 %v693_v31 }
 0x2dc   :  { %v2158_v32 = vpop.eup %2157 }
 0x33d   :  { %v704_v33 = vpop.permute.xlu0 %703 }
 0x33e   :  { %v706_v34 = vmul.f32 %v2158_v32, %v704_v33 }
 0x340   :  { %708 = vrot.lane.b32.xlu1 %v706_v34, %s2399_s9 }
 0x341   :  { %v699_v35 = vpop.permute.xlu0 %698 }
 0x342   :  { %v701_v36 = vmul.f32 %v2158_v32, %v699_v35 }
 0x3b2   :  { %v709_v37 = vpop.permute.xlu1 %708 }
 0x3b3   :  { %v711_v38 = vadd.f32 %v709_v37, %v701_v36 }
 0x3b5   :  { %2159 = vtanh.f32 %v711_v38 }
 0x3c2   :  { %v2160_v39 = vpop.eup %2159 }
 0x3c3   :  { %714 = vrot.lane.b32.xlu1 %v2160_v39, %s2399_s9 }
 0x435   :  { %v715_v40 = vpop.permute.xlu1 %714 }
 0x436   :  { %v717_v43 = vmul.f32 %v2158_v32, %v715_v40 }
 0x438   :  { %719 = vrot.lane.b32.xlu0 %v717_v43, %s2400_s2 }
 0x4aa   :  { %v720_v45 = vpop.permute.xlu0 %719 }
 0x4ab   :  { %1994 = vmatmul.mubr.msk.f32.vlgmr.msra.gmra.mxu1 %vm332_vm2, %v720_v45 }
 0x4ac   :  { %2008 = vmatpush3.msra.mxu1 %v2561_v42  ;;  %2015 = vmatprep.mubr.msk.f32.mxu1 %vm2398_vm3, %v2397_v41 }
 0x4ad   :  { %2009 = vmatprep.subr.mxu1 %v2397_v41 }
 0x4ae   :  { %2010 = vmatpush3.msra.mxu1 %v2565_v44 }
 0x4af   :  { %2011 = vmatprep.subr.mxu1 %v2397_v41 }
 0x4b0   :  { %2012 = vmatpush3.msra.mxu1 %v2569_v46 }
 0x4b1   :  { %2013 = vmatprep.subr.mxu1 %v2397_v41 }
 0x4b2   :  { %2014 = vmatpush3.msra.mxu1 %v2573_v47 }
 0x4b3   :  { %2029 = vmatprep.subr.mxu1 %v2397_v41 }
 0x56b   :  { %v789_v48 = vpop.f32.mrf.mxu1 }
 0x56c   :  { %v793_v49 = vadd.f32 %v789_v48, %v577_v14 }
 0x56d   :  { %v1995_v50 = vpop.f32.mrf.mxu1 }
 0x56e   :  { %2161 = vtanh.f32 %v793_v49  ;;  %v1794_v52 = vmul.f32 -1.442695, %v793_v49 }
 0x570   :  { %2163 = vpow2.f32 %v1794_v52 }
 0x57b   :  { %v2162_v51 = vpop.eup %2161 }
 0x57c   :  { %803 = vrot.lane.b32.xlu1 %v2162_v51, %s2399_s9 }
 0x57d   :  { %v2164_v53 = vpop.eup %2163 }
 0x57e   :  { %v797_v54 = vadd.f32 1.0, %v2164_v53 }
 0x580   :  { %2165 = vrcp.f32 %v797_v54 }
 0x58d   :  { %v2166_v55 = vpop.eup %2165 }
 0x58e   :  { %v801_v58 = vmul.f32 %v2166_v55, %v711_v38 }
 0x5ee   :  { %v804_v56 = vpop.permute.xlu1 %803 }
 0x5ef   :  { %v806_v57 = vmul.f32 %v2166_v55, %v804_v56 }
 0x5f1   :  { %808 = vrot.lane.b32.xlu0 %v806_v57, %s2399_s9 }
 0x663   :  { %v809_v59 = vpop.permute.xlu0 %808 }
 0x664   :  { %v811_v60 = vadd.f32 %v809_v59, %v801_v58 }
 0x666   :  { %2167 = vtanh.f32 %v811_v60 }
 0x673   :  { %v2168_v61 = vpop.eup %2167 }
 0x674   :  { %814 = vrot.lane.b32.xlu1 %v2168_v61, %s2399_s9 }
 0x6e6   :  { %v815_v62 = vpop.permute.xlu1 %814 }
 0x6e7   :  { %v817_v63 = vmul.f32 %v2166_v55, %v815_v62 }
 0x6e9   :  { %819 = vrot.lane.b32.xlu0 %v817_v63, %s2400_s2 }
 0x75b   :  { %v820_v0 = vpop.permute.xlu0 %819 }
 0x75c   :  { %2005 = vmatmul.mubr.msk.f32.vlgmr.msra.gmra.mxu0 %vm332_vm2, %v820_v0 }
 0x75d   :  { %2019 = vmatpush3.msra.mxu0 %v2561_v42  ;;  %2026 = vmatprep.mubr.msk.f32.mxu0 %vm2398_vm3, %v2397_v41 }
 0x75e   :  { %2020 = vmatprep.subr.mxu0 %v2397_v41 }
 0x75f   :  { %2021 = vmatpush3.msra.mxu0 %v2565_v44 }
 0x760   :  { %2022 = vmatprep.subr.mxu0 %v2397_v41 }
 0x761   :  { %2023 = vmatpush3.msra.mxu0 %v2569_v46 }
 0x762   :  { %2024 = vmatprep.subr.mxu0 %v2397_v41 }
 0x763   :  { %2025 = vmatpush3.msra.mxu0 %v2573_v47 }
 0x764   :  { %2040 = vmatprep.subr.mxu0 %v2397_v41 }
 0x81c   :  { %v889_v3 = vpop.f32.mrf.mxu0 }
 0x81d   :  { %v893_v4 = vadd.f32 %v889_v3, %v582_v2 }
 0x81e   :  { %v2006_v5 = vpop.f32.mrf.mxu0 }
 0x81f   :  { %2169 = vtanh.f32 %v893_v4  ;;  %v1796_v7 = vmul.f32 -1.442695, %v893_v4 }
 0x821   :  { %2171 = vpow2.f32 %v1796_v7 }
 0x82c   :  { %v2170_v6 = vpop.eup %2169 }
 0x82d   :  { %903 = vrot.lane.b32.xlu1 %v2170_v6, %s2399_s9 }
 0x82e   :  { %v2172_v8 = vpop.eup %2171 }
 0x82f   :  { %v897_v9 = vadd.f32 1.0, %v2172_v8 }
 0x831   :  { %2173 = vrcp.f32 %v897_v9 }
 0x83e   :  { %v2174_v10 = vpop.eup %2173 }
 0x83f   :  { %v901_v14 = vmul.f32 %v2174_v10, %v811_v60 }
 0x89f   :  { %v904_v11 = vpop.permute.xlu1 %903 }
 0x8a0   :  { %v906_v13 = vmul.f32 %v2174_v10, %v904_v11  ;;  %v602_v11 = vadd.f32 %v2618_v12, %v2670_v1 }
 0x8a2   :  { %908 = vrot.lane.b32.xlu0 %v906_v13, %s2399_s9 }
 0x914   :  { %v909_v15 = vpop.permute.xlu0 %908 }
 0x915   :  { %v911_v16 = vadd.f32 %v909_v15, %v901_v14 }
 0x917   :  { %2175 = vtanh.f32 %v911_v16 }
 0x924   :  { %v2176_v17 = vpop.eup %2175 }
 0x925   :  { %914 = vrot.lane.b32.xlu1 %v2176_v17, %s2399_s9 }
 0x997   :  { %v915_v18 = vpop.permute.xlu1 %914 }
 0x998   :  { %v917_v20 = vmul.f32 %v2174_v10, %v915_v18 }
 0x99a   :  { %919 = vrot.lane.b32.xlu0 %v917_v20, %s2400_s2 }
 0xa0c   :  { %v920_v21 = vpop.permute.xlu0 %919 }
 0xa0d   :  { %2016 = vmatmul.mubr.msk.f32.vlgmr.msra.gmra.mxu1 %vm332_vm2, %v920_v21 }
 0xa0e   :  { %2030 = vmatpush3.msra.mxu1 %v2561_v42  ;;  %2037 = vmatprep.mubr.msk.f32.mxu1 %vm2398_vm3, %v2397_v41 }
 0xa0f   :  { %2031 = vmatprep.subr.mxu1 %v2397_v41 }
 0xa10   :  { %2032 = vmatpush3.msra.mxu1 %v2565_v44 }
 0xa11   :  { %2033 = vmatprep.subr.mxu1 %v2397_v41 }
 0xa12   :  { %2034 = vmatpush3.msra.mxu1 %v2569_v46 }
 0xa13   :  { %2035 = vmatprep.subr.mxu1 %v2397_v41 }
 0xa14   :  { %2036 = vmatpush3.msra.mxu1 %v2573_v47 }
 0xa15   :  { %2051 = vmatprep.subr.mxu1 %v2397_v41 }
 0xacd   :  { %v989_v23 = vpop.f32.mrf.mxu1 }
 0xace   :  { %v993_v25 = vadd.f32 %v989_v23, %v2623_v19 }
 0xacf   :  { %v2017_v26 = vpop.f32.mrf.mxu1 }
 0xad0   :  { %2177 = vtanh.f32 %v993_v25  ;;  %v1798_v29 = vmul.f32 -1.442695, %v993_v25 }
 0xad2   :  { %2179 = vpow2.f32 %v1798_v29 }
 0xadd   :  { %v2178_v28 = vpop.eup %2177 }
 0xade   :  { %1003 = vrot.lane.b32.xlu1 %v2178_v28, %s2399_s9 }
 0xadf   :  { %v2180_v30 = vpop.eup %2179 }
 0xae0   :  { %v997_v31 = vadd.f32 1.0, %v2180_v30 }
 0xae2   :  { %2181 = vrcp.f32 %v997_v31 }
 0xaef   :  { %v2182_v32 = vpop.eup %2181 }
 0xaf0   :  { %v1001_v35 = vmul.f32 %v2182_v32, %v911_v16 }
 0xb50   :  { %v1004_v33 = vpop.permute.xlu1 %1003 }
 0xb51   :  { %v1006_v34 = vmul.f32 %v2182_v32, %v1004_v33 }
 0xb53   :  { %1008 = vrot.lane.b32.xlu0 %v1006_v34, %s2399_s9 }
 0xbc5   :  { %v1009_v36 = vpop.permute.xlu0 %1008 }
 0xbc6   :  { %v1011_v37 = vadd.f32 %v1009_v36, %v1001_v35 }
 0xbc8   :  { %2183 = vtanh.f32 %v1011_v37 }
 0xbd5   :  { %v2184_v19 = vpop.eup %2183 }
 0xbd6   :  { %1014 = vrot.lane.b32.xlu1 %v2184_v19, %s2399_s9 }
 0xc48   :  { %v1015_v38 = vpop.permute.xlu1 %1014 }
 0xc49   :  { %v1017_v39 = vmul.f32 %v2182_v32, %v1015_v38 }
 0xc4b   :  { %1019 = vrot.lane.b32.xlu0 %v1017_v39, %s2400_s2 }
 0xcbd   :  { %v1020_v40 = vpop.permute.xlu0 %1019 }
 0xcbe   :  { %2027 = vmatmul.mubr.msk.f32.vlgmr.msra.gmra.mxu0 %vm332_vm2, %v1020_v40 }
 0xcbf   :  { %2041 = vmatpush3.msra.mxu0 %v2561_v42  ;;  %2048 = vmatprep.mubr.msk.f32.mxu0 %vm2398_vm3, %v2397_v41 }
 0xcc0   :  { %2042 = vmatprep.subr.mxu0 %v2397_v41 }
 0xcc1   :  { %2043 = vmatpush3.msra.mxu0 %v2565_v44 }
 0xcc2   :  { %2044 = vmatprep.subr.mxu0 %v2397_v41 }
 0xcc3   :  { %2045 = vmatpush3.msra.mxu0 %v2569_v46 }
 0xcc4   :  { %2046 = vmatprep.subr.mxu0 %v2397_v41 }
 0xcc5   :  { %2047 = vmatpush3.msra.mxu0 %v2573_v47 }
 0xcc6   :  { %2062 = vmatprep.subr.mxu0 %v2397_v41 }
 0xd7e   :  { %v1089_v43 = vpop.f32.mrf.mxu0 }
 0xd7f   :  { %v1093_v45 = vadd.f32 %v1089_v43, %v2631_v24 }
 0xd80   :  { %v2028_v48 = vpop.f32.mrf.mxu0 }
 0xd81   :  { %2185 = vtanh.f32 %v1093_v45  ;;  %v1800_v50 = vmul.f32 -1.442695, %v1093_v45 }
 0xd83   :  { %2187 = vpow2.f32 %v1800_v50  ;;  %v1419_v50 = vld [vmem:[#allocation9 + $0x8] sm:$0xff] }
 0xd8e   :  { %v2186_v49 = vpop.eup %2185 }
 0xd8f   :  { %1103 = vrot.lane.b32.xlu1 %v2186_v49, %s2399_s9  ;;  %v1420_v49 = vld [vmem:[#allocation9 + $0x10] sm:$0xff] }
 0xd90   :  { %v2188_v51 = vpop.eup %2187 }
 0xd91   :  { %v1097_v52 = vadd.f32 1.0, %v2188_v51  ;;  %v1418_v51 = vld [vmem:[#allocation9] sm:$0xff] }
 0xd93   :  { %2189 = vrcp.f32 %v1097_v52 }
 0xda0   :  { %v2190_v53 = vpop.eup %2189 }
 0xda1   :  { %v1101_v56 = vmul.f32 %v2190_v53, %v1011_v37 }
 0xe01   :  { %v1104_v54 = vpop.permute.xlu1 %1103 }
 0xe02   :  { %v1106_v55 = vmul.f32 %v2190_v53, %v1104_v54 }
 0xe04   :  { %1108 = vrot.lane.b32.xlu0 %v1106_v55, %s2399_s9  ;;  %v1520_v55 = vld [vmem:[#allocation10 + $0x78] sm:$0xff] }
 0xe76   :  { %v1109_v57 = vpop.permute.xlu0 %1108 }
 0xe77   :  { %v1111_v58 = vadd.f32 %v1109_v57, %v1101_v56  ;;  %v1519_v56 = vld [vmem:[#allocation10 + $0x70] sm:$0xff]  ;;  %v1518_v57 = vld [vmem:[#allocation10 + $0x68] sm:$0xff] }
 0xe79   :  { %2191 = vtanh.f32 %v1111_v58 }
 0xe86   :  { %v2192_v24 = vpop.eup %2191 }
 0xe87   :  { %1114 = vrot.lane.b32.xlu1 %v2192_v24, %s2399_s9  ;;  %v1516_v24 = vld [vmem:[#allocation10 + $0x58] sm:$0xff] }
 0xef9   :  { %v1115_v59 = vpop.permute.xlu1 %1114 }
 0xefa   :  { %v1117_v60 = vmul.f32 %v2190_v53, %v1115_v59  ;;  %v1515_v59 = vld [vmem:[#allocation10 + $0x50] sm:$0xff] }
 0xefc   :  { %1119 = vrot.lane.b32.xlu0 %v1117_v60, %s2400_s2  ;;  %v1514_v60 = vld [vmem:[#allocation10 + $0x48] sm:$0xff] }
 0xf6e   :  { %v1120_v61 = vpop.permute.xlu0 %1119 }
 0xf6f   :  { %2038 = vmatmul.mubr.msk.f32.vlgmr.msra.gmra.mxu1 %vm332_vm2, %v1120_v61  ;;  %v1513_v61 = vld [vmem:[#allocation10 + $0x40] sm:$0xff] }
 0xf70   :  { %2052 = vmatpush3.msra.mxu1 %v2561_v42  ;;  %2059 = vmatprep.mubr.msk.f32.mxu1 %vm2398_vm3, %v2397_v41 }
 0xf71   :  { %2053 = vmatprep.subr.mxu1 %v2397_v41 }
 0xf72   :  { %2054 = vmatpush3.msra.mxu1 %v2565_v44 }
 0xf73   :  { %2055 = vmatprep.subr.mxu1 %v2397_v41 }
 0xf74   :  { %2056 = vmatpush3.msra.mxu1 %v2569_v46 }
 0xf75   :  { %2057 = vmatprep.subr.mxu1 %v2397_v41 }
 0xf76   :  { %2058 = vmatpush3.msra.mxu1 %v2573_v47 }
 0xf77   :  { %2073 = vmatprep.subr.mxu1 %v2397_v41 }
0x102f   :  { %v1189_v62 = vpop.f32.mrf.mxu1 }
0x1030   :  { %v1193_v42 = vadd.f32 %v1189_v62, %v2628_v22  ;;  %v1512_v62 = vld [vmem:[#allocation10 + $0x38] sm:$0xff] }
0x1031   :  { %v2039_v63 = vpop.f32.mrf.mxu1 }
0x1032   :  { %2193 = vtanh.f32 %v1193_v42  ;;  %v1802_v2 = vmul.f32 -1.442695, %v1193_v42  ;;  %v1511_v42 = vld [vmem:[#allocation10 + $0x30] sm:$0xff]  ;;  %v1510_v63 = vld [vmem:[#allocation10 + $0x28] sm:$0xff] }
0x1034   :  { %2195 = vpow2.f32 %v1802_v2  ;;  %v1508_v2 = vld [vmem:[#allocation10 + $0x18] sm:$0xff] }
0x103f   :  { %v2194_v0 = vpop.eup %2193 }
0x1040   :  { %1203 = vrot.lane.b32.xlu1 %v2194_v0, %s2399_s9  ;;  %v1509_v0 = vld [vmem:[#allocation10 + $0x20] sm:$0xff] }
0x1041   :  { %v2196_v44 = vpop.eup %2195 }
0x1042   :  { %v1197_v3 = vadd.f32 1.0, %v2196_v44  ;;  %v1601_v44 = vld [vmem:[#allocation12 + $0x18] sm:$0xff] }
0x1044   :  { %2197 = vrcp.f32 %v1197_v3 }
0x1051   :  { %v2198_v46 = vpop.eup %2197 }
0x1052   :  { %v1201_v47 = vmul.f32 %v2198_v46, %v1111_v58  ;;  %v1517_v58 = vld [vmem:[#allocation10 + $0x60] sm:$0xff] }
0x10b2   :  { %v1204_v4 = vpop.permute.xlu1 %1203 }
0x10b3   :  { %v1206_v5 = vmul.f32 %v2198_v46, %v1204_v4  ;;  %v1599_v4 = vld [vmem:[#allocation12 + $0x8] sm:$0xff] }
0x10b5   :  { %1208 = vrot.lane.b32.xlu0 %v1206_v5, %s2399_s9  ;;  %v1598_v5 = vld [vmem:[#allocation12] sm:$0xff] }
0x1127   :  { %v1209_v6 = vpop.permute.xlu0 %1208 }
0x1128   :  { %v1211_v7 = vadd.f32 %v1209_v6, %v1201_v47  ;;  %v1676_v47 = vld [vmem:[#allocation13 + $0x18] sm:$0xff]  ;;  %v1675_v6 = vld [vmem:[#allocation13 + $0x10] sm:$0xff] }
0x112a   :  { %2199 = vtanh.f32 %v1211_v7 }
0x1137   :  { %v2200_v22 = vpop.eup %2199 }
0x1138   :  { %1214 = vrot.lane.b32.xlu1 %v2200_v22, %s2399_s9  ;;  %v1673_v22 = vld [vmem:[#allocation13] sm:$0xff] }
0x11aa   :  { %v1215_v8 = vpop.permute.xlu1 %1214 }
0x11ab   :  { %v1217_v9 = vmul.f32 %v2198_v46, %v1215_v8  ;;  %v1600_v46 = vld [vmem:[#allocation12 + $0x10] sm:$0xff] }
0x11ad   :  { %1219 = vrot.lane.b32.xlu0 %v1217_v9, %s2400_s2  ;;  %v1507_v9 = vld [vmem:[#allocation10 + $0x10] sm:$0xff] }
0x121f   :  { %v1220_v10 = vpop.permute.xlu0 %1219 }
0x1220   :  { %2049 = vmatmul.mubr.msk.f32.vlgmr.msra.gmra.mxu0 %vm332_vm2, %v1220_v10  ;;  %v1506_v10 = vld [vmem:[#allocation10 + $0x8] sm:$0xff] }
0x1221   :  { %2070 = vmatprep.mubr.msk.f32.mxu0 %vm2398_vm3, %v2397_v41 }
0x12e0   :  { %v1289_v13 = vpop.f32.mrf.mxu0 }
0x12e1   :  { %v1293_v14 = vadd.f32 %v1289_v13, %v602_v11  ;;  %v1505_v11 = vld [vmem:[#allocation10] sm:$0xff] }
0x12e2   :  { %v2050_v15 = vpop.f32.mrf.mxu0  ;;  %v1807_v13 = vld [vmem:[%s2796_s11] ss:$0 sm:$0xff] }
0x12e3   :  { %2201 = vtanh.f32 %v1293_v14  ;;  %v1804_v17 = vmul.f32 -1.442695, %v1293_v14 }
0x12e5   :  { %2203 = vpow2.f32 %v1804_v17 }
0x12f0   :  { %v2202_v16 = vpop.eup %2201 }
0x12f1   :  { %1303 = vrot.lane.b32.xlu1 %v2202_v16, %s2399_s9 }
0x12f2   :  { %v2204_v18 = vpop.eup %2203 }
0x12f3   :  { %v1297_v20 = vadd.f32 1.0, %v2204_v18 }
0x12f5   :  { %2205 = vrcp.f32 %v1297_v20 }
0x1302   :  { %v2206_v21 = vpop.eup %2205 }
0x1303   :  { %v1301_v26 = vmul.f32 %v2206_v21, %v1211_v7  ;;  %v1674_v7 = vld [vmem:[#allocation13 + $0x8] sm:$0xff] }
0x1363   :  { %v1304_v23 = vpop.permute.xlu1 %1303 }
0x1364   :  { %v1306_v25 = vmul.f32 %v2206_v21, %v1304_v23 }
0x1366   :  { %1308 = vrot.lane.b32.xlu0 %v1306_v25, %s2399_s9  ;;  %v1809_v25 = vld [vmem:[%s2798_s13] ss:$0 sm:$0xff] }
0x13d8   :  { %v1309_v28 = vpop.permute.xlu0 %1308 }
0x13d9   :  { %v1311_v12 = vadd.f32 %v1309_v28, %v1301_v26 }
0x13db   :  { %2207 = vtanh.f32 %v1311_v12 }
0x13e8   :  { %v2208_v1 = vpop.eup %2207 }
0x13e9   :  { %1314 = vrot.lane.b32.xlu1 %v2208_v1, %s2399_s9 }
0x145b   :  { %v1315_v29 = vpop.permute.xlu1 %1314 }
0x145c   :  { %v1317_v30 = vmul.f32 %v2206_v21, %v1315_v29 }
0x145e   :  { %1319 = vrot.lane.b32.xlu0 %v1317_v30, %s2400_s2 }
0x14d0   :  { %v1320_v31 = vpop.permute.xlu0 %1319 }
0x14d1   :  { %2060 = vmatmul.mubr.msk.f32.vlgmr.msra.gmra.mxu1 %vm332_vm2, %v1320_v31 }
0x14d2   :  { %2105 = vmatprep.mubr.msk.f32.mxu1 %vm2398_vm3, %v2397_v41  ;;  %2074 = vmatpush3.msra.mxu1 %v1520_v55 }
0x14d3   :  { %2075 = vmatprep.subr.mxu1 %v2397_v41 }
0x14d4   :  { %2076 = vmatpush3.msra.mxu1 %v1519_v56 }
0x14d5   :  { %2077 = vmatprep.subr.mxu1 %v2397_v41 }
0x14d6   :  { %2078 = vmatpush3.msra.mxu1 %v1518_v57 }
0x14d7   :  { %2079 = vmatprep.subr.mxu1 %v2397_v41 }
0x14d8   :  { %2080 = vmatpush3.msra.mxu1 %v1517_v58 }
0x14d9   :  { %2081 = vmatprep.subr.mxu1 %v2397_v41 }
0x14da   :  { %2082 = vmatpush3.msra.mxu1 %v1516_v24 }
0x14db   :  { %2083 = vmatprep.subr.mxu1 %v2397_v41 }
0x14dc   :  { %2084 = vmatpush3.msra.mxu1 %v1515_v59 }
0x14dd   :  { %2085 = vmatprep.subr.mxu1 %v2397_v41 }
0x14de   :  { %2086 = vmatpush3.msra.mxu1 %v1514_v60 }
0x14df   :  { %2087 = vmatprep.subr.mxu1 %v2397_v41 }
0x14e0   :  { %2088 = vmatpush3.msra.mxu1 %v1513_v61 }
0x14e1   :  { %2089 = vmatprep.subr.mxu1 %v2397_v41 }
0x14e2   :  { %2090 = vmatpush3.msra.mxu1 %v1512_v62 }
0x14e3   :  { %2091 = vmatprep.subr.mxu1 %v2397_v41 }
0x14e4   :  { %2092 = vmatpush3.msra.mxu1 %v1511_v42 }
0x14e5   :  { %2093 = vmatprep.subr.mxu1 %v2397_v41 }
0x14e6   :  { %2094 = vmatpush3.msra.mxu1 %v1510_v63 }
0x14e7   :  { %2095 = vmatprep.subr.mxu1 %v2397_v41 }
0x14e8   :  { %2096 = vmatpush3.msra.mxu1 %v1509_v0 }
0x14e9   :  { %2097 = vmatprep.subr.mxu1 %v2397_v41 }
0x14ea   :  { %2098 = vmatpush3.msra.mxu1 %v1508_v2 }
0x14eb   :  { %2099 = vmatprep.subr.mxu1 %v2397_v41 }
0x14ec   :  { %2100 = vmatpush3.msra.mxu1 %v1507_v9 }
0x14ed   :  { %2101 = vmatprep.subr.mxu1 %v2397_v41 }
0x14ee   :  { %2102 = vmatpush3.msra.mxu1 %v1506_v10 }
0x14ef   :  { %2103 = vmatprep.subr.mxu1 %v2397_v41 }
0x14f0   :  { %2104 = vmatpush3.msra.mxu1 %v1505_v11 }
0x1591   :  { %v1389_v32 = vpop.f32.mrf.mxu1 }
0x1592   :  { %v1393_v33 = vadd.f32 %v1389_v32, %v2635_v27  ;;  %v1421_v27 = vld [vmem:[#allocation9 + $0x18] sm:$0xff] }
0x1593   :  { %v2061_v34 = vpop.f32.mrf.mxu1  ;;  %2063 = vmatpush3.msra.mxu0 %v1421_v27 }
0x1594   :  { %2209 = vtanh.f32 %v1393_v33  ;;  %v1806_v36 = vmul.f32 -1.442695, %v1393_v33  ;;  %2064 = vmatprep.subr.mxu0 %v2397_v41 }
0x1595   :  { %2065 = vmatpush3.msra.mxu0 %v1420_v49 }
0x1596   :  { %2211 = vpow2.f32 %v1806_v36  ;;  %2066 = vmatprep.subr.mxu0 %v2397_v41 }
0x1597   :  { %2067 = vmatpush3.msra.mxu0 %v1419_v50 }
0x1598   :  { %2068 = vmatprep.subr.mxu0 %v2397_v41 }
0x1599   :  { %2069 = vmatpush3.msra.mxu0 %v1418_v51 }
0x159a   :  { %2108 = vmatprep.subr.mxu0 %v2397_v41 }
0x15a1   :  { %v2210_v35 = vpop.eup %2209 }
0x15a2   :  { %1403 = vrot.lane.b32.xlu1 %v2210_v35, %s2399_s9 }
0x15a3   :  { %v2212_v37 = vpop.eup %2211 }
0x15a4   :  { %v1397_v19 = vadd.f32 1.0, %v2212_v37 }
0x15a6   :  { %2213 = vrcp.f32 %v1397_v19 }
0x15b3   :  { %v2214_v38 = vpop.eup %2213 }
0x15b4   :  { %v1401_v43 = vmul.f32 %v2214_v38, %v1311_v12 }
0x1614   :  { %v1404_v39 = vpop.permute.xlu1 %1403 }
0x1615   :  { %v1406_v40 = vmul.f32 %v2214_v38, %v1404_v39 }
0x1617   :  { %1408 = vrot.lane.b32.xlu0 %v1406_v40, %s2399_s9 }
0x1689   :  { %v1409_v45 = vpop.permute.xlu0 %1408 }
0x168a   :  { %v1411_v48 = vadd.f32 %v1409_v45, %v1401_v43 }
0x168c   :  { %2215 = vtanh.f32 %v1411_v48 }
0x1699   :  { %v2216_v52 = vpop.eup %2215 }
0x169a   :  { %1414 = vrot.lane.b32.xlu1 %v2216_v52, %s2399_s9 }
0x169e   :  { %1678 = vrot.lane.b32.xlu1 %v1411_v48, %s2401_s21 }
0x170c   :  { %v1415_v53 = vpop.permute.xlu1 %1414 }
0x170d   :  { %v1417_v54 = vmul.f32 %v2214_v38, %v1415_v53 }
0x170f   :  { %1430 = vrot.lane.b32.xlu0 %v1417_v54, %s2400_s2 }
0x1710   :  { %v1679_v8 = vpop.permute.xlu1 %1678 }
0x1781   :  { %v1431_v3 = vpop.permute.xlu0 %1430 }
0x1782   :  { %2071 = vmatmul.mubr.msk.f32.vlgmr.msra.gmra.mxu0 %vm332_vm2, %v1431_v3 }
0x1783   :  { %2109 = vmatpush3.msra.mxu0 %v1601_v44  ;;  %2116 = vmatprep.mubr.msk.f32.mxu0 %vm2398_vm3, %v2397_v41 }
0x1784   :  { %2110 = vmatprep.subr.mxu0 %v2397_v41 }
0x1785   :  { %2111 = vmatpush3.msra.mxu0 %v1600_v46 }
0x1786   :  { %2112 = vmatprep.subr.mxu0 %v2397_v41 }
0x1787   :  { %2113 = vmatpush3.msra.mxu0 %v1599_v4 }
0x1788   :  { %2114 = vmatprep.subr.mxu0 %v2397_v41 }
0x1789   :  { %2115 = vmatpush3.msra.mxu0 %v1598_v5 }
0x178a   :  { %2117 = vmatmul.mubr.msk.f32.vlgmr.msra.gmra.mxu0 %vm332_vm2, %v1431_v3  ;;  %2119 = vmatprep.subr.mxu0 %v2397_v41 }
0x178b   :  { %2120 = vmatpush3.msra.mxu0 %v1676_v47  ;;  %2127 = vmatprep.mubr.msk.f32.mxu0 %vm2398_vm3, %v2397_v41 }
0x178c   :  { %2121 = vmatprep.subr.mxu0 %v2397_v41 }
0x178d   :  { %2122 = vmatpush3.msra.mxu0 %v1675_v6 }
0x178e   :  { %2123 = vmatprep.subr.mxu0 %v2397_v41 }
0x178f   :  { %2124 = vmatpush3.msra.mxu0 %v1674_v7 }
0x1790   :  { %2125 = vmatprep.subr.mxu0 %v2397_v41 }
0x1791   :  { %2126 = vmatpush3.msra.mxu0 %v1673_v22 }
0x1792   :  { %2128 = vmatmul.mubr.msk.f32.vlgmr.msra.gmra.mxu0 %vm332_vm2, %v1679_v8 }
0x1842   :  { %v1500_v14 = vpop.f32.mrf.mxu0 }
0x1843   :  { %v1501_v15 = vadd.f32 %v1807_v13, %v1500_v14 }
0x1844   :  { %v2072_v16 = vpop.f32.mrf.mxu0 }
0x1845   :  { %v1504_v17 = vmax.f32 %v1501_v15, 0.0 }
0x1847   :  { %2106 = vmatmul.mubr.f32.vlgmr.msra.gmra.mxu1 %v1504_v17 }
0x184a   :  { %v1668_v18 = vpop.f32.mrf.mxu0 }
0x184c   :  { %v2118_v20 = vpop.f32.mrf.mxu0 }
0x1852   :  { %v1748_v21 = vpop.f32.mrf.mxu0 }
0x1854   :  { %v2129_v23 = vpop.f32.mrf.mxu0 }
0x1907   :  { %v1594_v26 = vpop.f32.mrf.mxu1 }
0x1908   :  { %v1595_v41 = vadd.f32 %v1809_v25, %v1594_v26 }
0x1909   :  { %v2107_v28 = vpop.f32.mrf.mxu1 }
0x190a   :  { %v1672_v12 = vadd.f32 %v1668_v18, %v1595_v41 }
0x190c   :  { %v1752_v1 = vadd.f32 %v1748_v21, %v1672_v12 }
0x190e   :  { %1753 = vst [vmem:[%s2801_s16] sm:$0xff] %v1752_v1 }
0x190f   :  { %1758 = vsyncpa [#allocation3], 1 }
0x1910   :  { %1759 = vsyncpa [#allocation5], 1 }
0x1911   :  { %1760 = vsyncpa [#allocation8], 1 }
0x1912   :  { %1761 = vsyncpa [#allocation11], 1 }
0x1913   :  { %1762 = vsyncpa [#allocation14], 1 }

</bundles_post_ra>
